<compile_context>
chip_gen: v6e
topology: v6e:2x2x1
jax: 0.10.0
libtpu: 0.0.40
codegen_flags: <defaults>
</compile_context>

<pallas_src>
import numpy as np
import jax
import jax.numpy as jnp
from jax.experimental import pallas as pl
from jax.experimental.pallas import tpu as pltpu

IMG = 32 * 32          # flattened padded image (lane dim, multiple of 128)
N_PATCH = 16           # 4x4 spatial grid of 2x2 quantum windows per image
DIM = 16               # 2^4 basis states of the 4-qubit circuit
NS = N_PATCH * DIM     # 256 = all basis-state amplitudes per image
TILE_B_DEFAULT = 512   # images per grid step (v7x-safe; sweep to 1024/2048 on v5e/v6e)


# ----------------------------------------------------------------------------
# Pallas kernel: full forward pass for one batch tile
# ----------------------------------------------------------------------------
def qcnn_fused_kernel(p_ref, w1_ref, b1_ref, w2_ref, b2_ref,
                      zt_ref, nrm_ref, cxc_ref, cxs_ref, mbfc_ref, fcb_ref,
                      out_ref):
    bf16, f32 = jnp.bfloat16, jnp.float32
    p = p_ref[...]                                                   # (T, 1024) bf16

    # conv1 (k=2, s=2, pad=2 already applied) + relu : 32x32 -> 16x16
    v1 = jnp.maximum(
        jnp.dot(p, w1_ref[...], preferred_element_type=f32) + b1_ref[...],
        0.0)                                                         # (T, 256) f32

    # conv2 (k=2, s=2) + relu : 16x16 -> 8x8   (bf16 operands, f32 accumulate)
    v2 = jnp.maximum(
        jnp.dot(v1.astype(bf16), w2_ref[...], preferred_element_type=f32)
        + b2_ref[...],
        0.0)                                                         # (T, 64) f32

    # ---- QuantumConv2d surrogate: analytic expectation of the circuit -----
    # Per 2x2 window x (16 windows/image): diagonal RZ/RZZ phase of state n is
    #   phi_n = -1/2 * (s_n + (s_n^2 - |x|^2)/2),  s_n = sum_i x_i z_i(n)
    v2b = v2.astype(bf16)
    s = jnp.dot(v2b, zt_ref[...], preferred_element_type=f32)              # (T, 256)
    n2 = jnp.dot((v2 * v2).astype(bf16), nrm_ref[...],
                 preferred_element_type=f32)                                # (T, 256)
    phi = -0.5 * (s + 0.5 * (s * s - n2))                                   # f32
    # keep the transcendental chain in f32 (no bf16 VPU/EUP on v5e)
    cphi = jnp.cos(phi)
    sphi = jnp.sin(phi)
    # psi = 0.25 * e^{i phi} pushed through the fixed RX/CX unitary:
    # two bf16 MXU passes (cos part and sin part); 0.25 is folded into CXC/CXS
    psi = (jnp.dot(cphi.astype(bf16), cxc_ref[...], preferred_element_type=f32)
           + jnp.dot(sphi.astype(bf16), cxs_ref[...], preferred_element_type=f32))
    probs = psi[:, :NS] * psi[:, :NS] + psi[:, NS:] * psi[:, NS:]           # (T, 256)

    # measured-bit expectation -> fc1 (MB @ FCW pre-folded; relu was a no-op)
    logits = (jnp.dot(probs.astype(bf16), mbfc_ref[...],
                      preferred_element_type=f32) + fcb_ref[...])           # (T, 10)

    # softmax
    m = jnp.max(logits, axis=-1, keepdims=True)
    e = jnp.exp(logits - m)
    out_ref[...] = e * pl.reciprocal(jnp.sum(e, axis=-1, keepdims=True), approx=True)


def run_qcnn(p, consts, tile_b):
    bp = p.shape[0]
    const_specs = [pl.BlockSpec(c.shape, lambda i: (0, 0)) for c in consts]
    return pl.pallas_call(
        qcnn_fused_kernel,
        out_shape=jax.ShapeDtypeStruct((bp, 10), jnp.float32),
        grid=(bp // tile_b,),
        in_specs=[pl.BlockSpec((tile_b, IMG), lambda i: (i, 0))] + const_specs,
        out_specs=pl.BlockSpec((tile_b, 10), lambda i: (i, 0)),
        compiler_params=pltpu.CompilerParams(
            dimension_semantics=("parallel",),
            # conservative for v7x (64 MiB physical VMEM); raise on v5e/v6e
            vmem_limit_bytes=32 * 1024 * 1024),
    )(p, *consts)


# ----------------------------------------------------------------------------
# Parameter setup (numpy / plain JAX glue)
# ----------------------------------------------------------------------------
def _round_up(n, m):
    return ((n + m - 1) // m) * m


def _build_quantum_matrices(w_flat):
    """Fixed 16x16 unitary A = CXring * RX(w) (transposed re/im), Z and bit matrices."""
    nq, dim = 4, 16

    def rx(theta):
        c, s = np.cos(theta / 2.0), np.sin(theta / 2.0)
        return np.array([[c, -1j * s], [-1j * s, c]], dtype=np.complex128)

    def on_qubit(g, qb):  # qubit 0 = least-significant bit (Qiskit convention)
        return np.kron(np.eye(2 ** (nq - 1 - qb)), np.kron(g, np.eye(2 ** qb)))

    def cx(c, t):
        m = np.zeros((dim, dim), dtype=np.complex128)
        for n in range(dim):
            m[(n ^ (1 << t)) if ((n >> c) & 1) else n, n] = 1.0
        return m

    u = np.eye(dim, dtype=np.complex128)
    for qb in range(nq):
        u = on_qubit(rx(float(w_flat[qb])), qb) @ u         # rx(conv_i, i)
    for qb in range(nq):
        u = cx(qb, (qb + 1) % nq) @ u                       # cx(i, (i+1)%4)

    # z[n, k] = +1/-1 eigenvalue of Z on qubit k for basis state n
    z = np.array([[1.0 - 2.0 * ((n >> k) & 1) for k in range(nq)]
                  for n in range(dim)], dtype=np.float32)   # (16, 4)
    # measured-bit matrix, columns in Qiskit bitstring order (q3..q0)
    m = np.array([[(n >> (nq - 1 - c)) & 1 for c in range(nq)]
                  for n in range(dim)], dtype=np.float32)   # (16, 4)
    return (np.ascontiguousarray(u.real.T).astype(np.float32),
            np.ascontiguousarray(u.imag.T).astype(np.float32), z, m)


def make_params(key):
    ks = jax.random.split(key, 7)
    w1 = 0.5 * jax.random.normal(ks[0], (2, 2), jnp.float32)   # conv1 weight
    b1 = 0.1 * jax.random.normal(ks[1], (), jnp.float32)       # conv1 bias
    w2 = 0.5 * jax.random.normal(ks[2], (2, 2), jnp.float32)   # conv2 weight
    b2 = 0.1 * jax.random.normal(ks[3], (), jnp.float32)       # conv2 bias
    qw = jax.random.normal(ks[4], (2, 2), jnp.float32)         # QuantumConv2d weight
    fcw = 0.1 * jax.random.normal(ks[5], (10, 64), jnp.float32)
    fcb = 0.1 * jax.random.normal(ks[6], (10,), jnp.float32)

    w1n, w2n = np.asarray(w1), np.asarray(w2)

    # conv1 as a (1024 -> 256) matmul over the flattened padded 32x32 image.
    w1big = np.zeros((IMG, 256), np.float32)
    for u in range(16):
        for v in range(16):
            for di in range(2):
                for dj in range(2):
                    w1big[(2 * u + di) * 32 + (2 * v + dj), u * 16 + v] = w1n[di, dj]

    # conv2 as a (256 -> 64) matmul over the 16x16 conv1 output.
    w2big = np.zeros((256, 64), np.float32)
    for a in range(8):
        for b_ in range(8):
            for di in range(2):
                for dj in range(2):
                    w2big[(2 * a + di) * 16 + (2 * b_ + dj), a * 8 + b_] = w2n[di, dj]

    art, ait, z, m = _build_quantum_matrices(np.asarray(qw).flatten())

    # ZT (64, 256): maps 8x8 conv2 output lanes to per-window <x, z(n)> sums.
    ztbig = np.zeros((64, NS), np.float32)
    for pr in range(4):
        for pc in range(4):
            pt = pr * 4 + pc
            for di in range(2):
                for dj in range(2):
                    k = di * 2 + dj                         # torch .flatten() order
                    lane = (2 * pr + di) * 8 + (2 * pc + dj)
                    ztbig[lane, pt * DIM:(pt + 1) * DIM] = z[:, k]
    nrmbig = np.abs(ztbig)                                  # broadcasts |x|^2 per window

    # Complex matmul (per-window 16x16 unitary) split into cos/sin (256,512)
    # halves; the 0.25 amplitude scale from H^4 is folded in here.
    bdr = np.kron(np.eye(N_PATCH, dtype=np.float32), art)
    bdi = np.kron(np.eye(N_PATCH, dtype=np.float32), ait)
    cxc = 0.25 * np.concatenate([bdr, bdi], axis=1)         # acts on cos(phi)
    cxs = 0.25 * np.concatenate([-bdi, bdr], axis=1)        # acts on sin(phi)

    # fc1 with the PyTorch flatten order (c*16 + p*4 + q) folded in.
    fcwn = np.asarray(fcw)
    fcwt = np.zeros((64, 10), np.float32)
    for pt in range(N_PATCH):
        for c in range(4):
            fcwt[pt * 4 + c, :] = fcwn[:, c * N_PATCH + pt]

    # Fold MB @ FCW into one (256,10) matrix.  Valid because relu(probs @ MB)
    # is a no-op: probs >= 0 and MB entries are {0, 1}.
    mbbig = np.kron(np.eye(N_PATCH, dtype=np.float32), m)              # (256, 64)
    assert mbbig.min() >= 0.0, "MB must be non-negative for the relu fold into fc1"
    mbfc = mbbig @ fcwt                                                 # (256, 10)

    return dict(
        W1=jnp.asarray(w1big, jnp.bfloat16),
        b1=jnp.full((1, 256), b1, jnp.float32),
        W2=jnp.asarray(w2big, jnp.bfloat16),
        b2=jnp.full((1, 64), b2, jnp.float32),
        ZT=jnp.asarray(ztbig, jnp.bfloat16),
        NRM=jnp.asarray(nrmbig, jnp.bfloat16),
        CXC=jnp.asarray(cxc, jnp.bfloat16),
        CXS=jnp.asarray(cxs, jnp.bfloat16),
        MBFC=jnp.asarray(mbfc, jnp.bfloat16),
        fcb=jnp.asarray(fcb).reshape(1, 10),
    )


def _consts_tuple(params):
    return (params["W1"], params["b1"], params["W2"], params["b2"],
            params["ZT"], params["NRM"], params["CXC"], params["CXS"],
            params["MBFC"], params["fcb"])


# ----------------------------------------------------------------------------
# Forward pass
# ----------------------------------------------------------------------------
def quantum_conv_net_forward(x, params, tile_b=TILE_B_DEFAULT):
    """x: (B, 1, 28, 28) float32 (NCHW, as in PyTorch)."""
    b = x.shape[0]
    xpad = jnp.pad(x[:, 0], ((0, 0), (2, 2), (2, 2)))            # conv1 padding=2
    p = xpad.reshape(b, IMG).astype(jnp.bfloat16)                # one image per row
    # Always generate >= 2 grid steps so both v7x TensorCores get work under
    # dimension_semantics=("parallel",); v5e/v6e (single TC) are unaffected.
    tb = min(tile_b, _round_up((b + 1) // 2, 8))
    bp = max(_round_up(b, tb), 2 * tb)                           # pad ragged batch
    if bp != b:
        p = jnp.pad(p, ((0, bp - b), (0, 0)))
    out = run_qcnn(p, _consts_tuple(params), tb)
    return out[:b]


def reference_forward(x, params):
    """Pure-jnp reference of the same math (same bf16 operand rounding)."""
    bf16, f32 = jnp.bfloat16, jnp.float32
    b = x.shape[0]
    xpad = jnp.pad(x[:, 0], ((0, 0), (2, 2), (2, 2)))
    p = xpad.reshape(b, IMG).astype(bf16)
    v1 = jnp.maximum(jnp.dot(p, params["W1"], preferred_element_type=f32)
                     + params["b1"], 0.0)
    v2 = jnp.maximum(jnp.dot(v1.astype(bf16), params["W2"],
                             preferred_element_type=f32) + params["b2"], 0.0)
    s = jnp.dot(v2.astype(bf16), params["ZT"], preferred_element_type=f32)
    n2 = jnp.dot((v2 * v2).astype(bf16), params["NRM"], preferred_element_type=f32)
    phi = -0.5 * (s + 0.5 * (s * s - n2))
    psi = (jnp.dot(jnp.cos(phi).astype(bf16), params["CXC"], preferred_element_type=f32)
           + jnp.dot(jnp.sin(phi).astype(bf16), params["CXS"], preferred_element_type=f32))
    probs = psi[:, :NS] ** 2 + psi[:, NS:] ** 2
    logits = jnp.dot(probs.astype(bf16), params["MBFC"],
                     preferred_element_type=f32) + params["fcb"]
    return jax.nn.softmax(logits, axis=-1)


if __name__ == "__main__":
    key = jax.random.PRNGKey(0)
    k_x, k_p = jax.random.split(key)
    x = jax.random.normal(k_x, (2, 1, 28, 28), dtype=jnp.float32)
    params = make_params(k_p)

    out = quantum_conv_net_forward(x, params)
    out = jax.block_until_ready(out)

    assert out.shape == (2, 10)
    assert bool(jnp.all(jnp.isfinite(out)))
    # softmax uses the EUP approx reciprocal -> loose tolerance on row sums
    assert bool(jnp.allclose(jnp.sum(out, axis=-1), 1.0, atol=1e-2))
    ref = reference_forward(x, params)
    assert bool(jnp.allclose(out, ref, atol=5e-2))

    print("KERNEL_OK")
</pallas_src>

<mosaic_0001>
module attributes {stable_mosaic.version = 11 : i64} {
  func.func @qcnn_fused_kernel(%arg0: i32, %arg1: memref<8x1024xbf16, #tpu.memory_space<vmem>>, %arg2: memref<1024x256xbf16, #tpu.memory_space<vmem>>, %arg3: memref<1x256xf32, #tpu.memory_space<vmem>>, %arg4: memref<256x64xbf16, #tpu.memory_space<vmem>>, %arg5: memref<1x64xf32, #tpu.memory_space<vmem>>, %arg6: memref<64x256xbf16, #tpu.memory_space<vmem>>, %arg7: memref<64x256xbf16, #tpu.memory_space<vmem>>, %arg8: memref<256x512xbf16, #tpu.memory_space<vmem>>, %arg9: memref<256x512xbf16, #tpu.memory_space<vmem>>, %arg10: memref<256x10xbf16, #tpu.memory_space<vmem>>, %arg11: memref<1x10xf32, #tpu.memory_space<vmem>>, %arg12: memref<8x10xf32, #tpu.memory_space<vmem>>) attributes {dimension_semantics = [#tpu.dimension_semantics<parallel>], iteration_bounds = array<i64: 2>, scalar_prefetch = 0 : i64, scratch_operands = 0 : i64, tpu.core_type = #tpu.core_type<tc>, window_params = [{transform_indices = @transform_0, window_bounds = array<i64: 8, 1024>}, {pipeline_mode = #tpu.pipeline_mode<synchronous>, transform_indices = @transform_1, window_bounds = array<i64: 1024, 256>}, {pipeline_mode = #tpu.pipeline_mode<synchronous>, transform_indices = @transform_2, window_bounds = array<i64: 1, 256>}, {pipeline_mode = #tpu.pipeline_mode<synchronous>, transform_indices = @transform_3, window_bounds = array<i64: 256, 64>}, {pipeline_mode = #tpu.pipeline_mode<synchronous>, transform_indices = @transform_4, window_bounds = array<i64: 1, 64>}, {pipeline_mode = #tpu.pipeline_mode<synchronous>, transform_indices = @transform_5, window_bounds = array<i64: 64, 256>}, {pipeline_mode = #tpu.pipeline_mode<synchronous>, transform_indices = @transform_6, window_bounds = array<i64: 64, 256>}, {pipeline_mode = #tpu.pipeline_mode<synchronous>, transform_indices = @transform_7, window_bounds = array<i64: 256, 512>}, {pipeline_mode = #tpu.pipeline_mode<synchronous>, transform_indices = @transform_8, window_bounds = array<i64: 256, 512>}, {pipeline_mode = #tpu.pipeline_mode<synchronous>, transform_indices = @transform_9, window_bounds = array<i64: 256, 10>}, {pipeline_mode = #tpu.pipeline_mode<synchronous>, transform_indices = @transform_10, window_bounds = array<i64: 1, 10>}, {transform_indices = @transform_11, window_bounds = array<i64: 8, 10>}]} {
    %c0 = arith.constant 0 : index
    %c0_0 = arith.constant 0 : index
    %0 = vector.load %arg1[%c0, %c0_0] : memref<8x1024xbf16, #tpu.memory_space<vmem>>, vector<8x1024xbf16>
    %c0_1 = arith.constant 0 : index
    %c0_2 = arith.constant 0 : index
    %1 = vector.load %arg2[%c0_1, %c0_2] : memref<1024x256xbf16, #tpu.memory_space<vmem>>, vector<1024x256xbf16>
    %cst = arith.constant dense<0.000000e+00> : vector<8x256xf32>
    %2 = tpu.matmul %0, %1, %cst {dimension_numbers = #tpu.dot_dimension_numbers<[1], [0], [0], [1], [0, 0, 1, 1], [], []>} : vector<8x1024xbf16>, vector<1024x256xbf16>, vector<8x256xf32> -> vector<8x256xf32>
    %c0_3 = arith.constant 0 : index
    %c0_4 = arith.constant 0 : index
    %3 = vector.load %arg3[%c0_3, %c0_4] : memref<1x256xf32, #tpu.memory_space<vmem>>, vector<1x256xf32>
    %4 = vector.broadcast %3 : vector<1x256xf32> to vector<8x256xf32>
    %5 = arith.addf %2, %4 : vector<8x256xf32>
    %cst_5 = arith.constant 0.000000e+00 : f32
    %6 = vector.broadcast %cst_5 : f32 to vector<8x256xf32>
    %7 = arith.maximumf %5, %6 : vector<8x256xf32>
    %8 = arith.truncf %7 : vector<8x256xf32> to vector<8x256xbf16>
    %c0_6 = arith.constant 0 : index
    %c0_7 = arith.constant 0 : index
    %9 = vector.load %arg4[%c0_6, %c0_7] : memref<256x64xbf16, #tpu.memory_space<vmem>>, vector<256x64xbf16>
    %cst_8 = arith.constant dense<0.000000e+00> : vector<8x64xf32>
    %10 = tpu.matmul %8, %9, %cst_8 {dimension_numbers = #tpu.dot_dimension_numbers<[1], [0], [0], [1], [0, 0, 1, 1], [], []>} : vector<8x256xbf16>, vector<256x64xbf16>, vector<8x64xf32> -> vector<8x64xf32>
    %c0_9 = arith.constant 0 : index
    %c0_10 = arith.constant 0 : index
    %11 = vector.load %arg5[%c0_9, %c0_10] : memref<1x64xf32, #tpu.memory_space<vmem>>, vector<1x64xf32>
    %12 = vector.broadcast %11 : vector<1x64xf32> to vector<8x64xf32>
    %13 = arith.addf %10, %12 : vector<8x64xf32>
    %cst_11 = arith.constant 0.000000e+00 : f32
    %14 = vector.broadcast %cst_11 : f32 to vector<8x64xf32>
    %15 = arith.maximumf %13, %14 : vector<8x64xf32>
    %16 = arith.truncf %15 : vector<8x64xf32> to vector<8x64xbf16>
    %c0_12 = arith.constant 0 : index
    %c0_13 = arith.constant 0 : index
    %17 = vector.load %arg6[%c0_12, %c0_13] : memref<64x256xbf16, #tpu.memory_space<vmem>>, vector<64x256xbf16>
    %cst_14 = arith.constant dense<0.000000e+00> : vector<8x256xf32>
    %18 = tpu.matmul %16, %17, %cst_14 {dimension_numbers = #tpu.dot_dimension_numbers<[1], [0], [0], [1], [0, 0, 1, 1], [], []>} : vector<8x64xbf16>, vector<64x256xbf16>, vector<8x256xf32> -> vector<8x256xf32>
    %19 = arith.mulf %15, %15 : vector<8x64xf32>
    %20 = arith.truncf %19 : vector<8x64xf32> to vector<8x64xbf16>
    %c0_15 = arith.constant 0 : index
    %c0_16 = arith.constant 0 : index
    %21 = vector.load %arg7[%c0_15, %c0_16] : memref<64x256xbf16, #tpu.memory_space<vmem>>, vector<64x256xbf16>
    %cst_17 = arith.constant dense<0.000000e+00> : vector<8x256xf32>
    %22 = tpu.matmul %20, %21, %cst_17 {dimension_numbers = #tpu.dot_dimension_numbers<[1], [0], [0], [1], [0, 0, 1, 1], [], []>} : vector<8x64xbf16>, vector<64x256xbf16>, vector<8x256xf32> -> vector<8x256xf32>
    %23 = arith.mulf %18, %18 : vector<8x256xf32>
    %24 = arith.subf %23, %22 : vector<8x256xf32>
    %cst_18 = arith.constant 5.000000e-01 : f32
    %25 = vector.broadcast %cst_18 : f32 to vector<8x256xf32>
    %26 = arith.mulf %25, %24 : vector<8x256xf32>
    %27 = arith.addf %18, %26 : vector<8x256xf32>
    %cst_19 = arith.constant -5.000000e-01 : f32
    %28 = vector.broadcast %cst_19 : f32 to vector<8x256xf32>
    %29 = arith.mulf %28, %27 : vector<8x256xf32>
    %30 = math.cos %29 : vector<8x256xf32>
    %31 = math.sin %29 : vector<8x256xf32>
    %32 = arith.truncf %30 : vector<8x256xf32> to vector<8x256xbf16>
    %c0_20 = arith.constant 0 : index
    %c0_21 = arith.constant 0 : index
    %33 = vector.load %arg8[%c0_20, %c0_21] : memref<256x512xbf16, #tpu.memory_space<vmem>>, vector<256x512xbf16>
    %cst_22 = arith.constant dense<0.000000e+00> : vector<8x512xf32>
    %34 = tpu.matmul %32, %33, %cst_22 {dimension_numbers = #tpu.dot_dimension_numbers<[1], [0], [0], [1], [0, 0, 1, 1], [], []>} : vector<8x256xbf16>, vector<256x512xbf16>, vector<8x512xf32> -> vector<8x512xf32>
    %35 = arith.truncf %31 : vector<8x256xf32> to vector<8x256xbf16>
    %c0_23 = arith.constant 0 : index
    %c0_24 = arith.constant 0 : index
    %36 = vector.load %arg9[%c0_23, %c0_24] : memref<256x512xbf16, #tpu.memory_space<vmem>>, vector<256x512xbf16>
    %cst_25 = arith.constant dense<0.000000e+00> : vector<8x512xf32>
    %37 = tpu.matmul %35, %36, %cst_25 {dimension_numbers = #tpu.dot_dimension_numbers<[1], [0], [0], [1], [0, 0, 1, 1], [], []>} : vector<8x256xbf16>, vector<256x512xbf16>, vector<8x512xf32> -> vector<8x512xf32>
    %38 = arith.addf %34, %37 : vector<8x512xf32>
    %39 = vector.extract_strided_slice %38 {offsets = [0, 0], sizes = [8, 256], strides = [1, 1]} : vector<8x512xf32> to vector<8x256xf32>
    %40 = vector.extract_strided_slice %38 {offsets = [0, 0], sizes = [8, 256], strides = [1, 1]} : vector<8x512xf32> to vector<8x256xf32>
    %41 = arith.mulf %39, %40 : vector<8x256xf32>
    %42 = vector.extract_strided_slice %38 {offsets = [0, 256], sizes = [8, 256], strides = [1, 1]} : vector<8x512xf32> to vector<8x256xf32>
    %43 = vector.extract_strided_slice %38 {offsets = [0, 256], sizes = [8, 256], strides = [1, 1]} : vector<8x512xf32> to vector<8x256xf32>
    %44 = arith.mulf %42, %43 : vector<8x256xf32>
    %45 = arith.addf %41, %44 : vector<8x256xf32>
    %46 = arith.truncf %45 : vector<8x256xf32> to vector<8x256xbf16>
    %c0_26 = arith.constant 0 : index
    %c0_27 = arith.constant 0 : index
    %47 = vector.load %arg10[%c0_26, %c0_27] : memref<256x10xbf16, #tpu.memory_space<vmem>>, vector<256x10xbf16>
    %cst_28 = arith.constant dense<0.000000e+00> : vector<8x10xf32>
    %48 = tpu.matmul %46, %47, %cst_28 {dimension_numbers = #tpu.dot_dimension_numbers<[1], [0], [0], [1], [0, 0, 1, 1], [], []>} : vector<8x256xbf16>, vector<256x10xbf16>, vector<8x10xf32> -> vector<8x10xf32>
    %c0_29 = arith.constant 0 : index
    %c0_30 = arith.constant 0 : index
    %49 = vector.load %arg11[%c0_29, %c0_30] : memref<1x10xf32, #tpu.memory_space<vmem>>, vector<1x10xf32>
    %50 = vector.broadcast %49 : vector<1x10xf32> to vector<8x10xf32>
    %51 = arith.addf %48, %50 : vector<8x10xf32>
    %cst_31 = arith.constant dense<0xFF800000> : vector<8xf32>
    %52 = vector.multi_reduction <maximumf>, %51, %cst_31 [1] : vector<8x10xf32> to vector<8xf32>
    %53 = vector.shape_cast %52 : vector<8xf32> to vector<8x1xf32>
    %54 = vector.broadcast %53 : vector<8x1xf32> to vector<8x10xf32>
    %55 = arith.subf %51, %54 : vector<8x10xf32>
    %56 = math.exp %55 : vector<8x10xf32>
    %cst_32 = arith.constant dense<0.000000e+00> : vector<8xf32>
    %57 = vector.multi_reduction <add>, %56, %cst_32 [1] : vector<8x10xf32> to vector<8xf32>
    %58 = vector.shape_cast %57 : vector<8xf32> to vector<8x1xf32>
    %59 = tpu.reciprocal %58 {approx = true} : vector<8x1xf32> -> vector<8x1xf32>
    %60 = vector.broadcast %59 : vector<8x1xf32> to vector<8x10xf32>
    %61 = arith.mulf %56, %60 : vector<8x10xf32>
    %c0_33 = arith.constant 0 : index
    %c0_34 = arith.constant 0 : index
    %62 = vector.load %arg12[%c0_33, %c0_34] : memref<8x10xf32, #tpu.memory_space<vmem>>, vector<8x10xf32>
    tpu.vector_store %arg12[%c0_33, %c0_34], %61 {strides = array<i32>} : memref<8x10xf32, #tpu.memory_space<vmem>>, vector<8x10xf32>,
    return
  }
  func.func @transform_0(%arg0: i32) -> (i32, i32) {
    %c0_i32 = arith.constant 0 : i32
    %c0_i32_0 = arith.constant 0 : i32
    return %arg0, %c0_i32 : i32, i32
  }
  func.func @transform_1(%arg0: i32) -> (i32, i32) {
    %c0_i32 = arith.constant 0 : i32
    %c0_i32_0 = arith.constant 0 : i32
    %c0_i32_1 = arith.constant 0 : i32
    return %c0_i32, %c0_i32_0 : i32, i32
  }
  func.func @transform_2(%arg0: i32) -> (i32, i32) {
    %c0_i32 = arith.constant 0 : i32
    %c0_i32_0 = arith.constant 0 : i32
    %c0_i32_1 = arith.constant 0 : i32
    return %c0_i32, %c0_i32_0 : i32, i32
  }
  func.func @transform_3(%arg0: i32) -> (i32, i32) {
    %c0_i32 = arith.constant 0 : i32
    %c0_i32_0 = arith.constant 0 : i32
    %c0_i32_1 = arith.constant 0 : i32
    return %c0_i32, %c0_i32_0 : i32, i32
  }
  func.func @transform_4(%arg0: i32) -> (i32, i32) {
    %c0_i32 = arith.constant 0 : i32
    %c0_i32_0 = arith.constant 0 : i32
    %c0_i32_1 = arith.constant 0 : i32
    return %c0_i32, %c0_i32_0 : i32, i32
  }
  func.func @transform_5(%arg0: i32) -> (i32, i32) {
    %c0_i32 = arith.constant 0 : i32
    %c0_i32_0 = arith.constant 0 : i32
    %c0_i32_1 = arith.constant 0 : i32
    return %c0_i32, %c0_i32_0 : i32, i32
  }
  func.func @transform_6(%arg0: i32) -> (i32, i32) {
    %c0_i32 = arith.constant 0 : i32
    %c0_i32_0 = arith.constant 0 : i32
    %c0_i32_1 = arith.constant 0 : i32
    return %c0_i32, %c0_i32_0 : i32, i32
  }
  func.func @transform_7(%arg0: i32) -> (i32, i32) {
    %c0_i32 = arith.constant 0 : i32
    %c0_i32_0 = arith.constant 0 : i32
    %c0_i32_1 = arith.constant 0 : i32
    return %c0_i32, %c0_i32_0 : i32, i32
  }
  func.func @transform_8(%arg0: i32) -> (i32, i32) {
    %c0_i32 = arith.constant 0 : i32
    %c0_i32_0 = arith.constant 0 : i32
    %c0_i32_1 = arith.constant 0 : i32
    return %c0_i32, %c0_i32_0 : i32, i32
  }
  func.func @transform_9(%arg0: i32) -> (i32, i32) {
    %c0_i32 = arith.constant 0 : i32
    %c0_i32_0 = arith.constant 0 : i32
    %c0_i32_1 = arith.constant 0 : i32
    return %c0_i32, %c0_i32_0 : i32, i32
  }
  func.func @transform_10(%arg0: i32) -> (i32, i32) {
    %c0_i32 = arith.constant 0 : i32
    %c0_i32_0 = arith.constant 0 : i32
    %c0_i32_1 = arith.constant 0 : i32
    return %c0_i32, %c0_i32_0 : i32, i32
  }
  func.func @transform_11(%arg0: i32) -> (i32, i32) {
    %c0_i32 = arith.constant 0 : i32
    %c0_i32_0 = arith.constant 0 : i32
    return %arg0, %c0_i32 : i32, i32
  }
}

</mosaic_0001>

<bundles_post_ra>
// kernel: tpu_custom_call.1
= control target key start
LH: loop header
LB: loop body
LE: loop exit
PB: predicated region body
PF: predicated region fallthrough
CT: control target
= control target key end

     0   :  { %16 = vsyncpa [#allocation3], 0  ;;  %s4995_s0 = inlined_call_operand.vmem [shape: bf16[16,1024], index: 0, kind: input, shape index: {}]   ;;  %s4996_s1 = inlined_call_operand.hbm [shape: bf16[1024,256], index: 1, kind: input, shape index: {}]   ;;  %s4997_s2 = inlined_call_operand.vmem [shape: f32[1,256], index: 2, kind: input, shape index: {}]   ;;  %s4998_s3 = inlined_call_operand.vmem [shape: bf16[256,64], index: 3, kind: input, shape index: {}]   ;;  %s4999_s4 = inlined_call_operand.vmem [shape: f32[1,64], index: 4, kind: input, shape index: {}]   ;;  %s5000_s5 = inlined_call_operand.vmem [shape: bf16[64,256], index: 5, kind: input, shape index: {}]   ;;  %s5001_s6 = inlined_call_operand.vmem [shape: bf16[64,256], index: 6, kind: input, shape index: {}]   ;;  %s5002_s7 = inlined_call_operand.hbm [shape: bf16[256,512], index: 7, kind: input, shape index: {}]   ;;  %s5003_s8 = inlined_call_operand.hbm [shape: bf16[256,512], index: 8, kind: input, shape index: {}]   ;;  %s5004_s9 = inlined_call_operand.vmem [shape: bf16[256,10], index: 9, kind: input, shape index: {}]   ;;  %s5005_s10 = inlined_call_operand.vmem [shape: f32[1,10], index: 10, kind: input, shape index: {}]   ;;  %s5006_s11 = inlined_call_operand.hbm [shape: f32[16,10], index: 11, kind: output, shape index: {}]  }
   0x1   :  { %17 = vsyncpa [#allocation6], 0 }
   0x2   :  { %18 = vsyncpa [#allocation4], 0 }
   0x3   :  { %20 = vsyncpa [#allocation4 + $0x1], 0  ;;  %s4600_s17 = smov 0   ;;  %s4602_s18 = smov 0  }
   0x4   :  { %s4604_s19 = smov 0   ;;  %s4606_s20 = smov 0  }
   0x5 LB: > { %5010 = sst [smem:[#allocation12_spill]] %s4519_s19  ;;  %s4621_s21 = sadd.s32 4294967295, %s4523_s20   ;;  %s4523_s20 = sphi %s4606_s20, %s5019_s20   ;;  %s4519_s19 = sphi %s4604_s19, %s5021_s19   ;;  %s4515_s18 = sphi %s4602_s18, %s5023_s18   ;;  %s4511_s17 = sphi %s4600_s17, %s5022_s17  }
   0x6   : > { %s3434_s22 = sadd.s32 4294967294, %s4523_s20   ;;  %s4625_s23 = sadd.s32 1, %s4523_s20  }
   0x7   : > { %5011 = sst [smem:[#allocation13_spill]] %s4625_s23  ;;  %s269_s24 = sadd.s32 1, %s4519_s19 }
   0x8   : > { %s266_s25 = ssub.s32 %s4523_s20, %s4625_s23  ;;  %p279_p0 = scmp.ne.s32.totalorder %s4519_s19, %s4515_s18 }
   0x9   : > { %p267_p1 = scmp.eq.s32.totalorder %s266_s25, 0  ;;  %p280_p2 = scmp.eq.s32.totalorder %s4621_s21, 1 }
   0xa   : > { %p285_p3 = scmp.ne.s32.totalorder %s4515_s18, %s4511_s17  ;;  %p286_p4 = scmp.eq.s32.totalorder %s3434_s22, 1 }
   0xb   : > { %s4636_s26 = scalar_select %p267_p1, %s4519_s19, %s269_s24  }
   0xc   : > { %p4638_p5 = por %p280_p2, %p279_p0  ;;  %p4642_p6 = por %p286_p4, %p285_p3 }
   0xd   : > { %5012 = sst [smem:[#allocation14_spill]] %s4636_s26  ;;  %p3435_p7 = scmp.ge.s32.totalorder %s4523_s20, 1 }
   0xe   : > { %p293_p8 = scmp.lt.s32.totalorder %s4523_s20, 3  ;;  %p3864_p9 = scmp.eq.s32.totalorder %s4621_s21, 0 }
   0xf   : > { %s4525_s30 = smov [#allocation5]   ;;  %s4526_s14 = smov [#allocation2]  }
  0x10   : > { %p4649_p10 = pnand %p3435_p7, %p293_p8  ;;  %s333_s12 = sshll.u32 %s4525_s30, 4  ;;  %s334_s12 = int_to_ptr.vmem [resolvable:$true] %s333_s12 }
  0x11   : > { %s305_s15 = sshll.u32 %s4526_s14, 4  ;;  %s4388_s16 = scalar_lea.vmem %s334_s12, 8192  ;;  %s306_s15 = int_to_ptr.vmem [resolvable:$true] %s305_s15 }
  0x12   : > { %p3850_p11 = pneg %p4649_p10  ;;  %p4389_p0 = scmp.ne.s32.totalorder %s334_s12, %s4388_s16 }
  0x13   : > { %p4396_p3 = scmp.lt.s32.totalorder %s334_s12, %s334_s12  ;;  %p4397_p4 = scmp.lt.s32.totalorder %s4388_s16, %s4388_s16 }
  0x14   : > { %p4657_p12 = pnand %p3864_p9, %p3850_p11 }
  0x15   : > { %p4398_p7 = por %p4397_p4, %p4396_p3 }
  0x16   : > { %p4379_p13 = pneg %p4657_p12 }
  0x18   : > { %p4391_p1 = pnand %p4389_p0, %p4379_p13 }
  0x1a   : > { %p4392_p2 = pneg %p4391_p1 }
  0x1c   : > { %p4399_p8 = pnand %p4398_p7, %p4392_p2 }
  0x1e   : > { %4402 = shalt.err (!%p4399_p8)
}
  0x1f   : > { %s4527_s22 = smov 256   ;;  %s4528_s24 = smov 16  }
  0x20   : > { %3856 = dma.hbm_to_vmem [thread:$0]  (!%p4657_p12), %s5002_s7, 8192, %s334_s12, [#allocation6], %s4527_s22, %s4527_s22, %s4528_s24  }
  0x21   : > { %s4414_s14 = scalar_lea.vmem %s306_s15, 16384  ;;  %p4422_p2 = scmp.lt.s32.totalorder %s306_s15, %s306_s15 }
  0x22   : > { %p4415_p11 = scmp.ne.s32.totalorder %s306_s15, %s4414_s14  ;;  %p4423_p3 = scmp.lt.s32.totalorder %s4414_s14, %s4414_s14 }
  0x24   : > { %p4417_p0 = pnand %p4415_p11, %p4379_p13  ;;  %p4424_p4 = por %p4423_p3, %p4422_p2 }
  0x26   : > { %p4418_p1 = pneg %p4417_p0 }
  0x28   : > { %p4425_p7 = pnand %p4424_p4, %p4418_p1 }
  0x2a   : > { %4428 = shalt.err (!%p4425_p7)
}
  0x2b   : > { %s4529_s16 = smov 128   ;;  %s4530_s26 = smov 8  }
  0x2c   : > { %3853 = dma.hbm_to_vmem [thread:$0]  (!%p4657_p12), %s4996_s1, 16384, %s306_s15, [#allocation3], %s4529_s16, %s4529_s16, %s4530_s26  }
  0x2d   : > { %s4531_s12 = smov [#allocation7]  }
  0x2e   : > { %s346_s25 = sshll.u32 %s4531_s12, 4  ;;  %s347_s25 = int_to_ptr.vmem [resolvable:$true] %s346_s25 }
  0x2f   : > { %s4440_s30 = scalar_lea.vmem %s347_s25, 8192  ;;  %p4448_p1 = scmp.lt.s32.totalorder %s347_s25, %s347_s25 }
  0x30   : > { %p4441_p8 = scmp.ne.s32.totalorder %s347_s25, %s4440_s30  ;;  %p4449_p2 = scmp.lt.s32.totalorder %s4440_s30, %s4440_s30 }
  0x32   : > { %p4443_p11 = pnand %p4441_p8, %p4379_p13  ;;  %p4450_p3 = por %p4449_p2, %p4448_p1 }
  0x34   : > { %p4444_p0 = pneg %p4443_p11 }
  0x36   : > { %p4451_p4 = pnand %p4450_p3, %p4444_p0 }
  0x38   : > { %4454 = shalt.err (!%p4451_p4)
}
  0x39   : > { %3859 = dma.hbm_to_vmem [thread:$0]  (!%p4657_p12), %s5003_s8, 8192, %s347_s25, [#allocation6], %s4527_s22, %s4527_s22, %s4528_s24  }
  0x3a   : > { %376 = sbr.rel (%p4649_p10) target bundleno = 1706 (0x6aa), region = 64 }
  0x3f   : > { %4498 = dma.done.wait (%p3864_p9), [#allocation3], 16384  }
  0x40   : > { %4500 = vsyncadd (%p3864_p9), [#allocation3], 4294950912 }
  0x41   : > { %4502 = dma.done.wait (%p3864_p9), [#allocation6], 16384  }
  0x42   : > { %4504 = vsyncadd (%p3864_p9), [#allocation6], 4294950912  ;;  %v3917_v0 = vld [vmem:[#allocation2 + $0x74] ss:$8 sps:$4 sm:$0xff]   ;;  %v3921_v2 = vld [vmem:[#allocation2 + $0x70] ss:$8 sps:$4 sm:$0xff]  }
  0x43   : > { %v3919_v1 = vld [vmem:[#allocation2 + $0x174] ss:$8 sps:$4 sm:$0xff]   ;;  %1242 = vmatprep.subr.bf16.mxu0 %v3917_v0  ;;  %v3922_v3 = vld [vmem:[#allocation2 + $0x170] ss:$8 sps:$4 sm:$0xff]   ;;  %v3923_v4 = vld [vmem:[#allocation2 + $0x64] ss:$8 sps:$4 sm:$0xff]  }
  0x44   : > { %1283 = vmatprep.subr.bf16.mxu1 %v3919_v1  ;;  %1243 = vmatpush1.bf16.msra.mxu0 %v3921_v2  ;;  %v3925_v5 = vld [vmem:[#allocation2 + $0x164] ss:$8 sps:$4 sm:$0xff]   ;;  %v3927_v6 = vld [vmem:[#allocation2 + $0x60] ss:$8 sps:$4 sm:$0xff]   ;;  %v3929_v8 = vld [vmem:[#allocation2 + $0x54] ss:$8 sps:$4 sm:$0xff]  }
  0x45   : > { %1284 = vmatpush1.bf16.msra.mxu1 %v3922_v3  ;;  %1244 = vmatprep.subr.bf16.mxu0 %v3923_v4  ;;  %v3928_v7 = vld [vmem:[#allocation2 + $0x160] ss:$8 sps:$4 sm:$0xff]   ;;  %v3931_v9 = vld [vmem:[#allocation2 + $0x154] ss:$8 sps:$4 sm:$0xff]   ;;  %v3933_v10 = vld [vmem:[#allocation2 + $0x50] ss:$8 sps:$4 sm:$0xff]  }
  0x46   : > { %1285 = vmatprep.subr.bf16.mxu1 %v3925_v5  ;;  %v3934_v11 = vld [vmem:[#allocation2 + $0x150] ss:$8 sps:$4 sm:$0xff]   ;;  %v3935_v12 = vld [vmem:[#allocation2 + $0x44] ss:$8 sps:$4 sm:$0xff]   ;;  %v3939_v14 = vld [vmem:[#allocation2 + $0x40] ss:$8 sps:$4 sm:$0xff]  }
  0x47   : > { %v3937_v13 = vld [vmem:[#allocation2 + $0x144] ss:$8 sps:$4 sm:$0xff]   ;;  %v3940_v15 = vld [vmem:[#allocation2 + $0x140] ss:$8 sps:$4 sm:$0xff]   ;;  %v3941_v16 = vld [vmem:[#allocation2 + $0x34] ss:$8 sps:$4 sm:$0xff]  }
  0x48   : > { %1245 = vmatpush1.bf16.msra.mxu0 %v3927_v6  ;;  %v3943_v17 = vld [vmem:[#allocation2 + $0x134] ss:$8 sps:$4 sm:$0xff]   ;;  %v3945_v18 = vld [vmem:[#allocation2 + $0x30] ss:$8 sps:$4 sm:$0xff]   ;;  %v3947_v20 = vld [vmem:[#allocation2 + $0x24] ss:$8 sps:$4 sm:$0xff]  }
  0x49   : > { %1286 = vmatpush1.bf16.msra.mxu1 %v3928_v7  ;;  %1246 = vmatprep.subr.bf16.mxu0 %v3929_v8  ;;  %v3946_v19 = vld [vmem:[#allocation2 + $0x130] ss:$8 sps:$4 sm:$0xff]   ;;  %v3949_v21 = vld [vmem:[#allocation2 + $0x124] ss:$8 sps:$4 sm:$0xff]   ;;  %v3951_v22 = vld [vmem:[#allocation2 + $0x20] ss:$8 sps:$4 sm:$0xff]  }
  0x4a   : > { %1287 = vmatprep.subr.bf16.mxu1 %v3931_v9  ;;  %v3952_v23 = vld [vmem:[#allocation2 + $0x120] ss:$8 sps:$4 sm:$0xff]   ;;  %v3953_v24 = vld [vmem:[#allocation2 + $0x14] ss:$8 sps:$4 sm:$0xff]   ;;  %v3957_v26 = vld [vmem:[#allocation2 + $0x10] ss:$8 sps:$4 sm:$0xff]  }
  0x4b   : > { %v3955_v25 = vld [vmem:[#allocation2 + $0x114] ss:$8 sps:$4 sm:$0xff]   ;;  %v3958_v27 = vld [vmem:[#allocation2 + $0x110] ss:$8 sps:$4 sm:$0xff]   ;;  %v3959_v28 = vld [vmem:[#allocation2 + $0x4] ss:$8 sps:$4 sm:$0xff]  }
  0x4c   : > { %1247 = vmatpush1.bf16.msra.mxu0 %v3933_v10  ;;  %v3961_v29 = vld [vmem:[#allocation2 + $0x104] ss:$8 sps:$4 sm:$0xff]   ;;  %v3963_v30 = vld [vmem:[#allocation2] ss:$8 sps:$4 sm:$0xff]   ;;  %v3965_v32 = vld [vmem:[#allocation2 + $0xf4] ss:$8 sps:$4 sm:$0xff]  }
  0x4d   : > { %1288 = vmatpush1.bf16.msra.mxu1 %v3934_v11  ;;  %1248 = vmatprep.subr.bf16.mxu0 %v3935_v12  ;;  %v3964_v31 = vld [vmem:[#allocation2 + $0x100] ss:$8 sps:$4 sm:$0xff]   ;;  %p424_p9 = scmp.lt.s32.totalorder %s4621_s21, 1  ;;  %v3967_v33 = vld [vmem:[#allocation2 + $0x1f4] ss:$8 sps:$4 sm:$0xff]   ;;  %vm1635_vm0 = vcmask 523264  }
  0x4e   : > { %1289 = vmatprep.subr.bf16.mxu1 %v3937_v13  ;;  %v3969_v34 = vld [vmem:[#allocation2 + $0xf0] ss:$8 sps:$4 sm:$0xff]   ;;  %v3971_v36 = vld [vmem:[#allocation2 + $0xe4] ss:$8 sps:$4 sm:$0xff]   ;;  %v3975_v38 = vld [vmem:[#allocation2 + $0xe0] ss:$8 sps:$4 sm:$0xff]  }
  0x4f   : > { %v3970_v35 = vld [vmem:[#allocation2 + $0x1f0] ss:$8 sps:$4 sm:$0xff]   ;;  %s425_s26 = scalar_select %p424_p9, %s4621_s21, 1  ;;  %v3973_v37 = vld [vmem:[#allocation2 + $0x1e4] ss:$8 sps:$4 sm:$0xff]  }
  0x50   : > { %1249 = vmatpush1.bf16.msra.mxu0 %v3939_v14  ;;  %v3976_v39 = vld [vmem:[#allocation2 + $0x1e0] ss:$8 sps:$4 sm:$0xff]   ;;  %v3977_v40 = vld [vmem:[#allocation2 + $0xd4] ss:$8 sps:$4 sm:$0xff]   ;;  %v3981_v42 = vld [vmem:[#allocation2 + $0xd0] ss:$8 sps:$4 sm:$0xff]  }
  0x51   : > { %1290 = vmatpush1.bf16.msra.mxu1 %v3940_v15  ;;  %1250 = vmatprep.subr.bf16.mxu0 %v3941_v16  ;;  %s3783_s29 = sshll.u32 %s425_s26, 5  ;;  %v3979_v41 = vld [vmem:[#allocation2 + $0x1d4] ss:$8 sps:$4 sm:$0xff]   ;;  %v3982_v43 = vld [vmem:[#allocation2 + $0x1d0] ss:$8 sps:$4 sm:$0xff]   ;;  %s421_s15 = sand.u32 1, %s4515_s18  }
  0x52   : > { %1291 = vmatprep.subr.bf16.mxu1 %v3943_v17  ;;  %s4708_s22 = scalar_lea.vmem %s4995_s0, %s3783_s29  ;;  %v3983_v44 = vld [vmem:[#allocation2 + $0xc4] ss:$8 sps:$4 sm:$0xff]   ;;  %v3987_v49 = vld [vmem:[#allocation2 + $0xc0] ss:$8 sps:$4 sm:$0xff]   ;;  %v3989_v52 = vld [vmem:[#allocation2 + $0xb4] ss:$8 sps:$4 sm:$0xff]  }
  0x53   : > { %v3985_v45 = vld [vmem:[#allocation2 + $0x1c4] ss:$8 sps:$4 sm:$0xff]   ;;  %v3988_v50 = vld [vmem:[#allocation2 + $0x1c0] ss:$8 sps:$4 sm:$0xff]   ;;  %v3991_v53 = vld [vmem:[#allocation2 + $0x1b4] ss:$8 sps:$4 sm:$0xff]  }
  0x54   : > { %1251 = vmatpush1.bf16.msra.mxu0 %v3945_v18  ;;  %v430_v46 = vld [vmem:[%s4708_s22] sm:$0xff]  ;;  %v431_v48 = vld [vmem:[%s4708_s22 + $0x8] sm:$0xff]  ;;  %v3993_v54 = vld [vmem:[#allocation2 + $0xb0] ss:$8 sps:$4 sm:$0xff]   ;;  %s3780_s24 = sshll.u32 %s4621_s21, 7  ;;  %s3331_s19 = scalar_lea.sflag [#allocation4], %s421_s15 }
  0x55   : > { %1292 = vmatpush1.bf16.msra.mxu1 %v3946_v19  ;;  %1252 = vmatprep.subr.bf16.mxu0 %v3947_v20  ;;  %v3448_v47 = vcombine.high %v430_v46, %v430_v46  ;;  %v3450_v51 = vcombine.high %v431_v48, %v431_v48  ;;  %v3994_v55 = vld [vmem:[#allocation2 + $0x1b0] ss:$8 sps:$4 sm:$0xff]   ;;  %v3995_v56 = vld [vmem:[#allocation2 + $0xa4] ss:$8 sps:$4 sm:$0xff]   ;;  %v3999_v58 = vld [vmem:[#allocation2 + $0xa0] ss:$8 sps:$4 sm:$0xff]   ;;  %v3447_v6 = vcombine.low %v430_v46, %v430_v46  ;;  %s3342_s30 = scalar_lea.hbm %s5006_s11, %s3780_s24 }
  0x56   : > { %1293 = vmatprep.subr.bf16.mxu1 %v3949_v21  ;;  %v3997_v57 = vld [vmem:[#allocation2 + $0x1a4] ss:$8 sps:$4 sm:$0xff]   ;;  %v4000_v59 = vld [vmem:[#allocation2 + $0x1a0] ss:$8 sps:$4 sm:$0xff]   ;;  %v4001_v60 = vld [vmem:[#allocation2 + $0x94] ss:$8 sps:$4 sm:$0xff]   ;;  %v3449_v7 = vcombine.low %v431_v48, %v431_v48 }
  0x57   : > { %1274 = vmatprep.mubr.bf16.mxu0 %v3448_v47  ;;  %1315 = vmatprep.mubr.bf16.mxu1 %v3450_v51  ;;  %v4003_v61 = vld [vmem:[#allocation2 + $0x194] ss:$8 sps:$4 sm:$0xff]   ;;  %v4005_v62 = vld [vmem:[#allocation2 + $0x90] ss:$8 sps:$4 sm:$0xff]   ;;  %v4007_v0 = vld [vmem:[#allocation2 + $0x84] ss:$8 sps:$4 sm:$0xff]  }
  0x58   : > { %1253 = vmatpush1.bf16.msra.mxu0 %v3951_v22  ;;  %v4006_v63 = vld [vmem:[#allocation2 + $0x190] ss:$8 sps:$4 sm:$0xff]   ;;  %v4009_v1 = vld [vmem:[#allocation2 + $0x184] ss:$8 sps:$4 sm:$0xff]   ;;  %v4011_v2 = vld [vmem:[#allocation2 + $0x80] ss:$8 sps:$4 sm:$0xff]  }
  0x59   : > { %1294 = vmatpush1.bf16.msra.mxu1 %v3952_v23  ;;  %1254 = vmatprep.subr.bf16.mxu0 %v3953_v24  ;;  %v4012_v3 = vld [vmem:[#allocation2 + $0x180] ss:$8 sps:$4 sm:$0xff]   ;;  %v4019_v4 = vld [vmem:[#allocation2 + $0x274] ss:$8 sps:$4 sm:$0xff]   ;;  %v4017_v8 = vld [vmem:[#allocation2 + $0x270] ss:$8 sps:$4 sm:$0xff]  }
  0x5a   : > { %1295 = vmatprep.subr.bf16.mxu1 %v3955_v25  ;;  %v4022_v5 = vld [vmem:[#allocation2 + $0x374] ss:$8 sps:$4 sm:$0xff]   ;;  %v4020_v9 = vld [vmem:[#allocation2 + $0x370] ss:$8 sps:$4 sm:$0xff]   ;;  %v4025_v10 = vld [vmem:[#allocation2 + $0x264] ss:$8 sps:$4 sm:$0xff]  }
  0x5b   : > { %v4028_v11 = vld [vmem:[#allocation2 + $0x364] ss:$8 sps:$4 sm:$0xff]   ;;  %v4023_v12 = vld [vmem:[#allocation2 + $0x260] ss:$8 sps:$4 sm:$0xff]   ;;  %v4031_v14 = vld [vmem:[#allocation2 + $0x254] ss:$8 sps:$4 sm:$0xff]  }
  0x5c   : > { %1255 = vmatpush1.bf16.msra.mxu0 %v3957_v26  ;;  %v4026_v13 = vld [vmem:[#allocation2 + $0x360] ss:$8 sps:$4 sm:$0xff]   ;;  %v4034_v15 = vld [vmem:[#allocation2 + $0x354] ss:$8 sps:$4 sm:$0xff]   ;;  %v4029_v16 = vld [vmem:[#allocation2 + $0x250] ss:$8 sps:$4 sm:$0xff]  }
  0x5d   : > { %1296 = vmatpush1.bf16.msra.mxu1 %v3958_v27  ;;  %1256 = vmatprep.subr.bf16.mxu0 %v3959_v28  ;;  %v4032_v17 = vld [vmem:[#allocation2 + $0x350] ss:$8 sps:$4 sm:$0xff]   ;;  %v4037_v18 = vld [vmem:[#allocation2 + $0x244] ss:$8 sps:$4 sm:$0xff]   ;;  %v4035_v20 = vld [vmem:[#allocation2 + $0x240] ss:$8 sps:$4 sm:$0xff]  }
  0x5e   : > { %1297 = vmatprep.subr.bf16.mxu1 %v3961_v29  ;;  %v4040_v19 = vld [vmem:[#allocation2 + $0x344] ss:$8 sps:$4 sm:$0xff]   ;;  %v4038_v21 = vld [vmem:[#allocation2 + $0x340] ss:$8 sps:$4 sm:$0xff]   ;;  %v4043_v22 = vld [vmem:[#allocation2 + $0x234] ss:$8 sps:$4 sm:$0xff]  }
  0x5f   : > { %v4046_v23 = vld [vmem:[#allocation2 + $0x334] ss:$8 sps:$4 sm:$0xff]   ;;  %v4041_v24 = vld [vmem:[#allocation2 + $0x230] ss:$8 sps:$4 sm:$0xff]   ;;  %v4049_v26 = vld [vmem:[#allocation2 + $0x224] ss:$8 sps:$4 sm:$0xff]  }
  0x60   : > { %1257 = vmatpush1.bf16.msra.mxu0 %v3963_v30  ;;  %v4044_v25 = vld [vmem:[#allocation2 + $0x330] ss:$8 sps:$4 sm:$0xff]   ;;  %v4052_v27 = vld [vmem:[#allocation2 + $0x324] ss:$8 sps:$4 sm:$0xff]   ;;  %v4047_v28 = vld [vmem:[#allocation2 + $0x220] ss:$8 sps:$4 sm:$0xff]  }
  0x61   : > { %1298 = vmatpush1.bf16.msra.mxu1 %v3964_v31  ;;  %1258 = vmatprep.subr.bf16.mxu0 %v3965_v32  ;;  %v4050_v29 = vld [vmem:[#allocation2 + $0x320] ss:$8 sps:$4 sm:$0xff]   ;;  %v4055_v30 = vld [vmem:[#allocation2 + $0x214] ss:$8 sps:$4 sm:$0xff]   ;;  %v4053_v32 = vld [vmem:[#allocation2 + $0x210] ss:$8 sps:$4 sm:$0xff]  }
  0x62   : > { %1299 = vmatprep.subr.bf16.mxu1 %v3967_v33  ;;  %v4058_v31 = vld [vmem:[#allocation2 + $0x314] ss:$8 sps:$4 sm:$0xff]   ;;  %v4056_v33 = vld [vmem:[#allocation2 + $0x310] ss:$8 sps:$4 sm:$0xff]   ;;  %v4073_v46 = vld [vmem:[#allocation2 + $0x2e4] ss:$8 sps:$4 sm:$0xff]  }
  0x63   : > { %v4076_v47 = vld [vmem:[#allocation2 + $0x3e4] ss:$8 sps:$4 sm:$0xff]   ;;  %v4071_v48 = vld [vmem:[#allocation2 + $0x2e0] ss:$8 sps:$4 sm:$0xff]   ;;  %v4082_v51 = vld [vmem:[#allocation2 + $0x3d4] ss:$8 sps:$4 sm:$0xff]  }
  0x64   : > { %1259 = vmatpush2.bf16.msra.mxu0 %v3969_v34  ;;  %v4713_v34 = vld [vmem:[%s4708_s22 + $0x10] sm:$0xff]  ;;  %s4539_s26 = smov [#allocation8]  }
  0x65   : > { %1300 = vmatpush2.bf16.msra.mxu1 %v3970_v35  ;;  %1260 = vmatprep.subr.bf16.mxu0 %v3971_v36  ;;  %v4716_v35 = vld [vmem:[%s4708_s22 + $0x18] sm:$0xff]  ;;  %v4061_v36 = vld [vmem:[#allocation2 + $0x204] ss:$8 sps:$4 sm:$0xff]   ;;  %s3444_s22 = sshll.u32 %s421_s15, 3  ;;  %s4459_s29 = sshll.u32 %s4539_s26, 4  ;;  %s4460_s29 = int_to_ptr.vmem [resolvable:$false] %s4459_s29 }
  0x66   : > { %1301 = vmatprep.subr.bf16.mxu1 %v3973_v37  ;;  %v4064_v37 = vld [vmem:[#allocation2 + $0x304] ss:$8 sps:$4 sm:$0xff]   ;;  %s423_s14 = scalar_lea.vmem [#allocation8], %s3444_s22  ;;  %s4461_s21 = scalar_lea.vmem %s4460_s29, 256 }
  0x67   : > { %s3344_s16 = sshll.u32 %s423_s14, 4  ;;  %s3345_s16 = int_to_ptr.vmem [resolvable:$true] %s3344_s16 }
  0x68   : > { %1261 = vmatpush2.bf16.msra.mxu0 %v3975_v38  ;;  %v3452_v38 = vcombine.high %v4713_v34, %v4713_v34  ;;  %s4455_s23 = scalar_lea.vmem %s3345_s16, 128  ;;  %p4462_p7 = scmp.lt.s32.totalorder %s3345_s16, %s4460_s29 }
  0x69   : > { %1302 = vmatpush2.bf16.msra.mxu1 %v3976_v39  ;;  %1262 = vmatprep.subr.bf16.mxu0 %v3977_v40  ;;  %v3454_v39 = vcombine.high %v4716_v35, %v4716_v35  ;;  %v4059_v40 = vld [vmem:[#allocation2 + $0x200] ss:$8 sps:$4 sm:$0xff]   ;;  %p4456_p10 = scmp.ne.s32.totalorder %s3345_s16, %s4455_s23  ;;  %p4463_p8 = scmp.lt.s32.totalorder %s4461_s21, %s4455_s23 }
  0x6a   : > { %1303 = vmatprep.subr.bf16.mxu1 %v3979_v41  ;;  %v4062_v41 = vld [vmem:[#allocation2 + $0x300] ss:$8 sps:$4 sm:$0xff]  }
  0x6b   : > { %p4457_p12 = pnand %p4456_p10, %p4638_p5  ;;  %p4464_p11 = por %p4463_p8, %p4462_p7 }
  0x6c   : > { %1263 = vmatpush2.bf16.msra.mxu0 %v3981_v42  ;;  %v4067_v42 = vld [vmem:[#allocation2 + $0x2f4] ss:$8 sps:$4 sm:$0xff]  }
  0x6d   : > { %1304 = vmatpush2.bf16.msra.mxu1 %v3982_v43  ;;  %1264 = vmatprep.subr.bf16.mxu0 %v3983_v44  ;;  %v4070_v43 = vld [vmem:[#allocation2 + $0x3f4] ss:$8 sps:$4 sm:$0xff]   ;;  %v4065_v44 = vld [vmem:[#allocation2 + $0x2f0] ss:$8 sps:$4 sm:$0xff]   ;;  %p4458_p13 = pneg %p4457_p12 }
  0x6e   : > { %1305 = vmatprep.subr.bf16.mxu1 %v3985_v45  ;;  %v4068_v45 = vld [vmem:[#allocation2 + $0x3f0] ss:$8 sps:$4 sm:$0xff]  }
  0x6f   : > { %p4465_p0 = pnand %p4464_p11, %p4458_p13 }
  0x70   : > { %1265 = vmatpush2.bf16.msra.mxu0 %v3987_v49  ;;  %v4074_v49 = vld [vmem:[#allocation2 + $0x3e0] ss:$8 sps:$4 sm:$0xff]  }
  0x71   : > { %1306 = vmatpush2.bf16.msra.mxu1 %v3988_v50  ;;  %1266 = vmatprep.subr.bf16.mxu0 %v3989_v52  ;;  %v4079_v50 = vld [vmem:[#allocation2 + $0x2d4] ss:$8 sps:$4 sm:$0xff]   ;;  %v4077_v52 = vld [vmem:[#allocation2 + $0x2d0] ss:$8 sps:$4 sm:$0xff]  }
  0x72   : > { %1307 = vmatprep.subr.bf16.mxu1 %v3991_v53  ;;  %v4080_v53 = vld [vmem:[#allocation2 + $0x3d0] ss:$8 sps:$4 sm:$0xff]  }
  0x74   : > { %1267 = vmatpush2.bf16.msra.mxu0 %v3993_v54  ;;  %v4085_v54 = vld [vmem:[#allocation2 + $0x2c4] ss:$8 sps:$4 sm:$0xff]  }
  0x75   : > { %1308 = vmatpush2.bf16.msra.mxu1 %v3994_v55  ;;  %1268 = vmatprep.subr.bf16.mxu0 %v3995_v56  ;;  %v4088_v55 = vld [vmem:[#allocation2 + $0x3c4] ss:$8 sps:$4 sm:$0xff]   ;;  %v4083_v56 = vld [vmem:[#allocation2 + $0x2c0] ss:$8 sps:$4 sm:$0xff]  }
  0x76   : > { %1309 = vmatprep.subr.bf16.mxu1 %v3997_v57  ;;  %v4086_v57 = vld [vmem:[#allocation2 + $0x3c0] ss:$8 sps:$4 sm:$0xff]  }
  0x78   : > { %1269 = vmatpush2.bf16.msra.mxu0 %v3999_v58  ;;  %v4091_v58 = vld [vmem:[#allocation2 + $0x2b4] ss:$8 sps:$4 sm:$0xff]  }
  0x79   : > { %1310 = vmatpush2.bf16.msra.mxu1 %v4000_v59  ;;  %1270 = vmatprep.subr.bf16.mxu0 %v4001_v60  ;;  %v4094_v59 = vld [vmem:[#allocation2 + $0x3b4] ss:$8 sps:$4 sm:$0xff]   ;;  %v4089_v60 = vld [vmem:[#allocation2 + $0x2b0] ss:$8 sps:$4 sm:$0xff]  }
  0x7a   : > { %1311 = vmatprep.subr.bf16.mxu1 %v4003_v61  ;;  %v4092_v61 = vld [vmem:[#allocation2 + $0x3b0] ss:$8 sps:$4 sm:$0xff]  }
  0x7c   : > { %1271 = vmatpush2.bf16.msra.mxu0 %v4005_v62  ;;  %v4097_v62 = vld [vmem:[#allocation2 + $0x2a4] ss:$8 sps:$4 sm:$0xff]  }
  0x7d   : > { %1312 = vmatpush2.bf16.msra.mxu1 %v4006_v63  ;;  %1272 = vmatprep.subr.bf16.mxu0 %v4007_v0  ;;  %v4100_v63 = vld [vmem:[#allocation2 + $0x3a4] ss:$8 sps:$4 sm:$0xff]   ;;  %v4095_v0 = vld [vmem:[#allocation2 + $0x2a0] ss:$8 sps:$4 sm:$0xff]  }
  0x7e   : > { %1313 = vmatprep.subr.bf16.mxu1 %v4009_v1  ;;  %v4098_v1 = vld [vmem:[#allocation2 + $0x3a0] ss:$8 sps:$4 sm:$0xff]  }
  0x80   : > { %1273 = vmatpush2.bf16.msra.mxu0 %v4011_v2  ;;  %v4103_v2 = vld [vmem:[#allocation2 + $0x294] ss:$8 sps:$4 sm:$0xff]  }
  0x81   : > { %1314 = vmatpush2.bf16.msra.mxu1 %v4012_v3  ;;  %1324 = vmatprep.subr.bf16.mxu0 %v4019_v4  ;;  %v4106_v3 = vld [vmem:[#allocation2 + $0x394] ss:$8 sps:$4 sm:$0xff]   ;;  %v4101_v4 = vld [vmem:[#allocation2 + $0x290] ss:$8 sps:$4 sm:$0xff]  }
  0x82   : > { %1365 = vmatprep.subr.bf16.mxu1 %v4022_v5  ;;  %v4104_v5 = vld [vmem:[#allocation2 + $0x390] ss:$8 sps:$4 sm:$0xff]  }
  0x83   : > { %1275 = vmatmul.mubr.bf16.vlgmr.msra.gmra.mxu0 %v3447_v6  ;;  %v4109_v6 = vld [vmem:[#allocation2 + $0x284] ss:$8 sps:$4 sm:$0xff]  }
  0x84   : > { %1316 = vmatmul.mubr.bf16.vlgmr.msra.gmra.mxu1 %v3449_v7  ;;  %1325 = vmatpush1.bf16.msra.mxu0 %v4017_v8  ;;  %v4112_v7 = vld [vmem:[#allocation2 + $0x384] ss:$8 sps:$4 sm:$0xff]   ;;  %v4107_v8 = vld [vmem:[#allocation2 + $0x280] ss:$8 sps:$4 sm:$0xff]  }
  0x85   : > { %1366 = vmatpush1.bf16.msra.mxu1 %v4020_v9  ;;  %1326 = vmatprep.subr.bf16.mxu0 %v4025_v10  ;;  %v4110_v9 = vld [vmem:[#allocation2 + $0x380] ss:$8 sps:$4 sm:$0xff]   ;;  %v3451_v10 = vcombine.low %v4713_v34, %v4713_v34 }
  0x86   : > { %1367 = vmatprep.subr.bf16.mxu1 %v4028_v11  ;;  %1356 = vmatprep.mubr.bf16.mxu0 %v3452_v38  ;;  %v3453_v11 = vcombine.low %v4716_v35, %v4716_v35 }
  0x87   : > { %1397 = vmatprep.mubr.bf16.mxu1 %v3454_v39 }
  0x88   : > { %1327 = vmatpush1.bf16.msra.mxu0 %v4023_v12  ;;  %v4117_v12 = vld [vmem:[%s4998_s3 + $0x78] sm:$0xff]  }
  0x89   : > { %1368 = vmatpush1.bf16.msra.mxu1 %v4026_v13  ;;  %1328 = vmatprep.subr.bf16.mxu0 %v4031_v14  ;;  %v4118_v13 = vld [vmem:[%s4998_s3 + $0x38] sm:$0xff]   ;;  %v4119_v14 = vld [vmem:[%s4998_s3 + $0x70] sm:$0xff]  }
  0x8a   : > { %1369 = vmatprep.subr.bf16.mxu1 %v4034_v15  ;;  %v4120_v15 = vld [vmem:[%s4998_s3 + $0x30] sm:$0xff]  }
  0x8c   : > { %1329 = vmatpush1.bf16.msra.mxu0 %v4029_v16  ;;  %v4121_v16 = vld [vmem:[%s4998_s3 + $0x68] sm:$0xff]  }
  0x8d   : > { %1370 = vmatpush1.bf16.msra.mxu1 %v4032_v17  ;;  %1330 = vmatprep.subr.bf16.mxu0 %v4037_v18  ;;  %v4122_v17 = vld [vmem:[%s4998_s3 + $0x28] sm:$0xff]   ;;  %v4123_v18 = vld [vmem:[%s4998_s3 + $0x60] sm:$0xff]  }
  0x8e   : > { %1371 = vmatprep.subr.bf16.mxu1 %v4040_v19  ;;  %v4124_v19 = vld [vmem:[%s4998_s3 + $0x20] sm:$0xff]  }
  0x90   : > { %1331 = vmatpush1.bf16.msra.mxu0 %v4035_v20  ;;  %v4125_v20 = vld [vmem:[%s4998_s3 + $0x58] sm:$0xff]  }
  0x91   : > { %1372 = vmatpush1.bf16.msra.mxu1 %v4038_v21  ;;  %1332 = vmatprep.subr.bf16.mxu0 %v4043_v22  ;;  %v4126_v21 = vld [vmem:[%s4998_s3 + $0x18] sm:$0xff]   ;;  %v4127_v22 = vld [vmem:[%s4998_s3 + $0x50] sm:$0xff]  }
  0x92   : > { %1373 = vmatprep.subr.bf16.mxu1 %v4046_v23  ;;  %v4128_v23 = vld [vmem:[%s4998_s3 + $0x10] sm:$0xff]  }
  0x94   : > { %1333 = vmatpush1.bf16.msra.mxu0 %v4041_v24  ;;  %v4129_v24 = vld [vmem:[%s4998_s3 + $0x48] sm:$0xff]  }
  0x95   : > { %1374 = vmatpush1.bf16.msra.mxu1 %v4044_v25  ;;  %1334 = vmatprep.subr.bf16.mxu0 %v4049_v26  ;;  %v4130_v25 = vld [vmem:[%s4998_s3 + $0x8] sm:$0xff]   ;;  %v4131_v26 = vld [vmem:[%s4998_s3 + $0x40] sm:$0xff]  }
  0x96   : > { %1375 = vmatprep.subr.bf16.mxu1 %v4052_v27  ;;  %v4132_v27 = vld [vmem:[%s4998_s3] sm:$0xff]  }
  0x98   : > { %1335 = vmatpush1.bf16.msra.mxu0 %v4047_v28  ;;  %v4133_v28 = vld [vmem:[%s5000_s5 + $0x30] ss:$8 sps:$4 sm:$0xff]  }
  0x99   : > { %1376 = vmatpush1.bf16.msra.mxu1 %v4050_v29  ;;  %1336 = vmatprep.subr.bf16.mxu0 %v4055_v30  ;;  %v4135_v29 = vld [vmem:[%s5000_s5 + $0x34] ss:$8 sps:$4 sm:$0xff]   ;;  %v4138_v30 = vld [vmem:[%s5000_s5 + $0x24] ss:$8 sps:$4 sm:$0xff]  }
  0x9a   : > { %1377 = vmatprep.subr.bf16.mxu1 %v4058_v31  ;;  %v4136_v31 = vld [vmem:[%s5000_s5 + $0x20] ss:$8 sps:$4 sm:$0xff]  }
  0x9c   : > { %1337 = vmatpush1.bf16.msra.mxu0 %v4053_v32 }
  0x9d   : > { %1378 = vmatpush1.bf16.msra.mxu1 %v4056_v33  ;;  %1338 = vmatprep.subr.bf16.mxu0 %v4061_v36 }
  0x9e   : > { %1379 = vmatprep.subr.bf16.mxu1 %v4064_v37 }
  0xa0   : > { %1339 = vmatpush1.bf16.msra.mxu0 %v4059_v40  ;;  %v564_v40 = vlaneseq }
  0xa1   : > { %1380 = vmatpush1.bf16.msra.mxu1 %v4062_v41  ;;  %1340 = vmatprep.subr.bf16.mxu0 %v4067_v42 }
  0xa2   : > { %1381 = vmatprep.subr.bf16.mxu1 %v4070_v43  ;;  %v565_v41 = vshrl.u32 %v564_v40, 7  ;;  %v562_v43 = vld [vmem:[%s4997_s2] sm:$0x3]  ;;  %v4180_v40 = vld [vmem:[#allocation7 + $0x8c] ss:$16 sps:$4 sm:$0xff]  }
  0xa4   : > { %1341 = vmatpush2.bf16.msra.mxu0 %v4065_v44  ;;  %v566_v42 = vsub.s32 0, %v565_v41  ;;  %v570_v44 = vsub.s32 1, %v565_v41  ;;  %v4175_v41 = vld [vmem:[#allocation7 + $0x80] ss:$16 sps:$4 sm:$0xff]  }
  0xa5   : > { %1382 = vmatpush2.bf16.msra.mxu1 %v4068_v45  ;;  %1342 = vmatprep.subr.bf16.mxu0 %v4073_v46 }
  0xa6   : > { %1383 = vmatprep.subr.bf16.mxu1 %v4076_v47  ;;  %v567_v45 = vrot.slane %v562_v43, %v566_v42  ;;  %v571_v46 = vrot.slane %v562_v43, %v570_v44  ;;  %v4178_v42 = vld [vmem:[#allocation7 + $0x88] ss:$16 sps:$4 sm:$0xff]   ;;  %v4183_v43 = vld [vmem:[#allocation7 + $0x64] ss:$16 sps:$4 sm:$0xff]   ;;  %v4186_v44 = vld [vmem:[#allocation7 + $0x6c] ss:$16 sps:$4 sm:$0xff]  }
  0xa8   : > { %1343 = vmatpush2.bf16.msra.mxu0 %v4071_v48 }
  0xa9   : > { %1384 = vmatpush2.bf16.msra.mxu1 %v4074_v49  ;;  %1344 = vmatprep.subr.bf16.mxu0 %v4079_v50 }
  0xaa   : > { %1385 = vmatprep.subr.bf16.mxu1 %v4082_v51 }
  0xac   : > { %1345 = vmatpush2.bf16.msra.mxu0 %v4077_v52 }
  0xad   : > { %1386 = vmatpush2.bf16.msra.mxu1 %v4080_v53  ;;  %1346 = vmatprep.subr.bf16.mxu0 %v4085_v54 }
  0xae   : > { %1387 = vmatprep.subr.bf16.mxu1 %v4088_v55 }
  0xb0   : > { %1347 = vmatpush2.bf16.msra.mxu0 %v4083_v56 }
  0xb1   : > { %1388 = vmatpush2.bf16.msra.mxu1 %v4086_v57  ;;  %1348 = vmatprep.subr.bf16.mxu0 %v4091_v58 }
  0xb2   : > { %1389 = vmatprep.subr.bf16.mxu1 %v4094_v59 }
  0xb4   : > { %1349 = vmatpush2.bf16.msra.mxu0 %v4089_v60 }
  0xb5   : > { %1390 = vmatpush2.bf16.msra.mxu1 %v4092_v61  ;;  %1350 = vmatprep.subr.bf16.mxu0 %v4097_v62 }
  0xb6   : > { %1391 = vmatprep.subr.bf16.mxu1 %v4100_v63 }
  0xb8   : > { %1351 = vmatpush2.bf16.msra.mxu0 %v4095_v0 }
  0xb9   : > { %1392 = vmatpush2.bf16.msra.mxu1 %v4098_v1  ;;  %1352 = vmatprep.subr.bf16.mxu0 %v4103_v2 }
  0xba   : > { %1393 = vmatprep.subr.bf16.mxu1 %v4106_v3  ;;  %v4141_v3 = vld [vmem:[%s5000_s5 + $0x14] ss:$8 sps:$4 sm:$0xff]  }
  0xbc   : > { %1353 = vmatpush2.bf16.msra.mxu0 %v4101_v4  ;;  %v4139_v4 = vld [vmem:[%s5000_s5 + $0x10] ss:$8 sps:$4 sm:$0xff]  }
  0xbd   : > { %1394 = vmatpush2.bf16.msra.mxu1 %v4104_v5  ;;  %1354 = vmatprep.subr.bf16.mxu0 %v4109_v6  ;;  %v4144_v5 = vld [vmem:[%s5000_s5 + $0x4] ss:$8 sps:$4 sm:$0xff]   ;;  %v4142_v6 = vld [vmem:[%s5000_s5] ss:$8 sps:$4 sm:$0xff]  }
  0xbe   : > { %1395 = vmatprep.subr.bf16.mxu1 %v4112_v7  ;;  %v4147_v7 = vld [vmem:[%s5001_s6 + $0x34] ss:$8 sps:$4 sm:$0xff]  }
  0xc0   : > { %1355 = vmatpush2.bf16.msra.mxu0 %v4107_v8  ;;  %v4532_v8 = vmov 0  }
  0xc1   : > { %1396 = vmatpush2.bf16.msra.mxu1 %v4110_v9  ;;  %3784 = vmatprep.subr.bf16.mxu0 %v4117_v12 }
  0xc2   : > { %1647 = vmatprep.subr.bf16.mxu1 %v4135_v29  ;;  %v4157_v29 = vld [vmem:[#allocation7 + $0xe0] ss:$16 sps:$4 sm:$0xff]  }
  0xc3   : > { %1357 = vmatmul.mubr.bf16.vlgmr.msra.gmra.mxu0 %v3451_v10  ;;  %v3583_v10 = vld [vmem:[%s4999_s4] ss:$0 sm:$0xff] }
  0xc4   : > { %1398 = vmatmul.mubr.bf16.vlgmr.msra.gmra.mxu1 %v3453_v11  ;;  %3785 = vmatpush3.bf16.msra.mxu0 %v4118_v13 }
  0xc5   : > { %3786 = vmatprep.subr.bf16.mxu0 %v4119_v14  ;;  %1648 = vmatpush1.bf16.msra.mxu1 %v4133_v28  ;;  %v4162_v28 = vld [vmem:[#allocation7 + $0xec] ss:$16 sps:$4 sm:$0xff]  }
  0xc6   : > { %1649 = vmatprep.subr.bf16.mxu1 %v4138_v30  ;;  %1671 = vmatprep.mubr.bf16.mxu1 %v4532_v8  ;;  %v4160_v30 = vld [vmem:[#allocation7 + $0xe8] ss:$16 sps:$4 sm:$0xff]  }
  0xc8   : > { %3787 = vmatpush3.bf16.msra.mxu0 %v4120_v15 }
  0xc9   : > { %3788 = vmatprep.subr.bf16.mxu0 %v4121_v16  ;;  %1650 = vmatpush1.bf16.msra.mxu1 %v4136_v31  ;;  %v4165_v31 = vld [vmem:[#allocation7 + $0xc4] ss:$16 sps:$4 sm:$0xff]  }
  0xca   : > { %1651 = vmatprep.subr.bf16.mxu1 %v4141_v3  ;;  %v4219_v3 = vld [vmem:[#allocation7 + $0x1a4] ss:$16 sps:$4 sm:$0xff]  }
  0xcc   : > { %3789 = vmatpush3.bf16.msra.mxu0 %v4122_v17  ;;  %v4145_v17 = vld [vmem:[%s5001_s6 + $0x30] ss:$8 sps:$4 sm:$0xff]  }
  0xcd   : > { %3790 = vmatprep.subr.bf16.mxu0 %v4123_v18  ;;  %1652 = vmatpush1.bf16.msra.mxu1 %v4139_v4  ;;  %v4217_v4 = vld [vmem:[#allocation7 + $0x1a0] ss:$16 sps:$4 sm:$0xff]  }
  0xce   : > { %1653 = vmatprep.subr.bf16.mxu1 %v4144_v5  ;;  %v4220_v5 = vld [vmem:[#allocation7 + $0x1a8] ss:$16 sps:$4 sm:$0xff]  }
  0xd0   : > { %3791 = vmatpush3.bf16.msra.mxu0 %v4124_v19  ;;  %v4150_v19 = vld [vmem:[%s5001_s6 + $0x24] ss:$8 sps:$4 sm:$0xff]  }
  0xd1   : > { %3792 = vmatprep.subr.bf16.mxu0 %v4125_v20  ;;  %1654 = vmatpush1.bf16.msra.mxu1 %v4142_v6  ;;  %v4148_v20 = vld [vmem:[%s5001_s6 + $0x20] ss:$8 sps:$4 sm:$0xff]   ;;  %v4222_v6 = vld [vmem:[#allocation7 + $0x1ac] ss:$16 sps:$4 sm:$0xff]  }
  0xd2   : > { %1741 = vmatprep.subr.bf16.mxu1 %v4147_v7  ;;  %v4225_v7 = vld [vmem:[#allocation7 + $0x184] ss:$16 sps:$4 sm:$0xff]  }
  0xd4   : > { %3793 = vmatpush3.bf16.msra.mxu0 %v4126_v21  ;;  %v4153_v21 = vld [vmem:[%s5001_s6 + $0x14] ss:$8 sps:$4 sm:$0xff]  }
  0xd5   : > { %3794 = vmatprep.subr.bf16.mxu0 %v4127_v22  ;;  %v4151_v22 = vld [vmem:[%s5001_s6 + $0x10] ss:$8 sps:$4 sm:$0xff]  }
  0xd8   : > { %3795 = vmatpush3.bf16.msra.mxu0 %v4128_v23  ;;  %v4156_v23 = vld [vmem:[%s5001_s6 + $0x4] ss:$8 sps:$4 sm:$0xff]  }
  0xd9   : > { %3796 = vmatprep.subr.bf16.mxu0 %v4129_v24  ;;  %v4154_v24 = vld [vmem:[%s5001_s6] ss:$8 sps:$4 sm:$0xff]  }
  0xdc   : > { %3797 = vmatpush3.bf16.msra.mxu0 %v4130_v25 }
  0xdd   : > { %3798 = vmatprep.subr.bf16.mxu0 %v4131_v26 }
  0xe0   : > { %3799 = vmatpush3.bf16.msra.mxu0 %v4132_v27  ;;  %v4159_v27 = vld [vmem:[#allocation7 + $0xe4] ss:$16 sps:$4 sm:$0xff]  }
  0xe1   : > { %2650 = vmatprep.subr.bf16.mxu0 %v4159_v27  ;;  %v4255_v27 = vld [vmem:[#allocation5 + $0xe4] ss:$16 sps:$4 sm:$0xff]  }
 0x143   : > { %v1276_v32 = vpop.f32.mrf.mxu0 }
 0x144   : > { %v1317_v33 = vpop.f32.mrf.mxu1  ;;  %v1277_v47 = vadd.f32 %v1276_v32, %v567_v45  ;;  %v4168_v32 = vld [vmem:[#allocation7 + $0xcc] ss:$16 sps:$4 sm:$0xff]   ;;  %v4181_v45 = vld [vmem:[#allocation7 + $0x60] ss:$16 sps:$4 sm:$0xff]  }
 0x145   : > { %v1278_v34 = vpop.f32.mrf.mxu0 }
 0x146   : > { %v1319_v35 = vpop.f32.mrf.mxu1  ;;  %v1279_v48 = vadd.f32 %v1278_v34, %v571_v46  ;;  %v1318_v49 = vadd.f32 %v1317_v33, %v1277_v47  ;;  %v4163_v33 = vld [vmem:[#allocation7 + $0xc0] ss:$16 sps:$4 sm:$0xff]   ;;  %v4166_v34 = vld [vmem:[#allocation7 + $0xc8] ss:$16 sps:$4 sm:$0xff]   ;;  %v4189_v47 = vld [vmem:[#allocation7 + $0x44] ss:$16 sps:$4 sm:$0xff]  }
 0x147   : > { %v1280_v36 = vpop.f32.mrf.mxu0  ;;  %v4184_v46 = vld [vmem:[#allocation7 + $0x68] ss:$16 sps:$4 sm:$0xff]  }
 0x148   : > { %v1321_v37 = vpop.f32.mrf.mxu1  ;;  %v1320_v52 = vadd.f32 %v1319_v35, %v1279_v48  ;;  %v4171_v35 = vld [vmem:[#allocation7 + $0xa4] ss:$16 sps:$4 sm:$0xff]   ;;  %v4174_v36 = vld [vmem:[#allocation7 + $0xac] ss:$16 sps:$4 sm:$0xff]  }
 0x149   : > { %v1281_v38 = vpop.f32.mrf.mxu0  ;;  %v4169_v37 = vld [vmem:[#allocation7 + $0xa0] ss:$16 sps:$4 sm:$0xff]   ;;  %v4192_v48 = vld [vmem:[#allocation7 + $0x4c] ss:$16 sps:$4 sm:$0xff]  }
 0x14a   : > { %v1322_v39 = vpop.f32.mrf.mxu1  ;;  %v4172_v38 = vld [vmem:[#allocation7 + $0xa8] ss:$16 sps:$4 sm:$0xff]  }
 0x14b   : > { %v4177_v39 = vld [vmem:[#allocation7 + $0x84] ss:$16 sps:$4 sm:$0xff]  }
 0x183   : > { %v1358_v50 = vpop.f32.mrf.mxu0 }
 0x184   : > { %v1399_v51 = vpop.f32.mrf.mxu1  ;;  %v1359_v53 = vadd.f32 %v1358_v50, %v1318_v49  ;;  %v4187_v49 = vld [vmem:[#allocation7 + $0x40] ss:$16 sps:$4 sm:$0xff]   ;;  %v4190_v50 = vld [vmem:[#allocation7 + $0x48] ss:$16 sps:$4 sm:$0xff]  }
 0x185   : > { %v1360_v54 = vpop.f32.mrf.mxu0 }
 0x186   : > { %v1401_v55 = vpop.f32.mrf.mxu1  ;;  %v1400_v56 = vadd.f32 %v1399_v51, %v1359_v53  ;;  %v1361_v57 = vadd.f32 %v1360_v54, %v1320_v52  ;;  %v4195_v51 = vld [vmem:[#allocation7 + $0x24] ss:$16 sps:$4 sm:$0xff]   ;;  %v4198_v52 = vld [vmem:[#allocation7 + $0x2c] ss:$16 sps:$4 sm:$0xff]   ;;  %v4193_v53 = vld [vmem:[#allocation7 + $0x20] ss:$16 sps:$4 sm:$0xff]  }
 0x187   : > { %v1362_v58 = vpop.f32.mrf.mxu0  ;;  %v4196_v54 = vld [vmem:[#allocation7 + $0x28] ss:$16 sps:$4 sm:$0xff]  }
 0x188   : > { %v1403_v59 = vpop.f32.mrf.mxu1  ;;  %v1402_v60 = vadd.f32 %v1401_v55, %v1361_v57  ;;  %v1406_v61 = vmax.f32 %v1400_v56, 0.0  ;;  %v4201_v55 = vld [vmem:[#allocation7 + $0x4] ss:$16 sps:$4 sm:$0xff]   ;;  %v4204_v56 = vld [vmem:[#allocation7 + $0xc] ss:$16 sps:$4 sm:$0xff]  }
 0x189   : > { %v1363_v62 = vpop.f32.mrf.mxu0  ;;  %v4199_v57 = vld [vmem:[#allocation7] ss:$16 sps:$4 sm:$0xff]   ;;  %v4202_v58 = vld [vmem:[#allocation7 + $0x8] ss:$16 sps:$4 sm:$0xff]   ;;  %v4207_v59 = vld [vmem:[#allocation7 + $0x1e4] ss:$16 sps:$4 sm:$0xff]  }
 0x18a   : > { %v1404_v63 = vpop.f32.mrf.mxu1  ;;  %v1407_v0 = vmax.f32 %v1402_v60, 0.0  ;;  %v1408_v2 = vpack.c.bf16 %v1406_v61, %v1406_v61  ;;  %v4210_v60 = vld [vmem:[#allocation7 + $0x1ec] ss:$16 sps:$4 sm:$0xff]   ;;  %v4205_v61 = vld [vmem:[#allocation7 + $0x1e0] ss:$16 sps:$4 sm:$0xff]  }
 0x18b   : > { %v4208_v62 = vld [vmem:[#allocation7 + $0x1e8] ss:$16 sps:$4 sm:$0xff]   ;;  %v4213_v63 = vld [vmem:[#allocation7 + $0x1c4] ss:$16 sps:$4 sm:$0xff]  }
 0x18c   : > { %v1409_v1 = vpack.c.bf16 %v1407_v0, %v1407_v0  ;;  %v4216_v0 = vld [vmem:[#allocation7 + $0x1cc] ss:$16 sps:$4 sm:$0xff]  }
 0x18e   : > { %1577 = vmatprep.mubr.bf16.mxu0 %v1409_v1  ;;  %v4211_v1 = vld [vmem:[#allocation7 + $0x1c0] ss:$16 sps:$4 sm:$0xff]  }
 0x18f   : > { %1578 = vmatmul.mubr.bf16.vlgmr.msra.gmra.mxu0 %v1408_v2  ;;  %v4214_v2 = vld [vmem:[#allocation7 + $0x1c8] ss:$16 sps:$4 sm:$0xff]  }
 0x190   : > { %2651 = vmatpush1.bf16.msra.mxu0 %v4157_v29 }
 0x191   : > { %2652 = vmatprep.subr.bf16.mxu0 %v4165_v31 }
 0x194   : > { %2653 = vmatpush1.bf16.msra.mxu0 %v4163_v33 }
 0x195   : > { %2654 = vmatprep.subr.bf16.mxu0 %v4171_v35 }
 0x198   : > { %2655 = vmatpush1.bf16.msra.mxu0 %v4169_v37 }
 0x199   : > { %2656 = vmatprep.subr.bf16.mxu0 %v4177_v39 }
 0x19c   : > { %2657 = vmatpush1.bf16.msra.mxu0 %v4175_v41 }
 0x19d   : > { %2658 = vmatprep.subr.bf16.mxu0 %v4183_v43 }
 0x1a0   : > { %2659 = vmatpush1.bf16.msra.mxu0 %v4181_v45 }
 0x1a1   : > { %2660 = vmatprep.subr.bf16.mxu0 %v4189_v47 }
 0x1a4   : > { %2661 = vmatpush1.bf16.msra.mxu0 %v4187_v49 }
 0x1a5   : > { %2662 = vmatprep.subr.bf16.mxu0 %v4195_v51 }
 0x1a8   : > { %2663 = vmatpush1.bf16.msra.mxu0 %v4193_v53 }
 0x1a9   : > { %2664 = vmatprep.subr.bf16.mxu0 %v4201_v55 }
 0x1ac   : > { %2665 = vmatpush1.bf16.msra.mxu0 %v4199_v57 }
 0x1ad   : > { %2666 = vmatprep.subr.bf16.mxu0 %v4207_v59 }
 0x1b0   : > { %2667 = vmatpush2.bf16.msra.mxu0 %v4205_v61 }
 0x1b1   : > { %2668 = vmatprep.subr.bf16.mxu0 %v4213_v63 }
 0x1b4   : > { %2669 = vmatpush2.bf16.msra.mxu0 %v4211_v1  ;;  %v4533_v1 = vmov 683565275  }
 0x1b5   : > { %2670 = vmatprep.subr.bf16.mxu0 %v4219_v3 }
 0x1b8   : > { %2671 = vmatpush2.bf16.msra.mxu0 %v4217_v4  ;;  %v4534_v4 = vmov 2475754826  }
 0x1b9   : > { %2672 = vmatprep.subr.bf16.mxu0 %v4225_v7 }
 0x24f   : > { %v3800_v9 = vpop.f32.mrf.mxu0 }
 0x251   : > { %v3801_v11 = vpop.f32.mrf.mxu0 }
 0x252   : > { %v3802_v12 = vadd.f32 %v3801_v11, %v3800_v9  ;;  %v4223_v9 = vld [vmem:[#allocation7 + $0x180] ss:$16 sps:$4 sm:$0xff]   ;;  %v4231_v11 = vld [vmem:[#allocation7 + $0x164] ss:$16 sps:$4 sm:$0xff]  }
 0x253   : > { %v3803_v13 = vpop.f32.mrf.mxu0  ;;  %2673 = vmatpush2.bf16.msra.mxu0 %v4223_v9 }
 0x254   : > { %v1580_v14 = vadd.f32 %v3802_v12, %v3583_v10  ;;  %v4226_v10 = vld [vmem:[#allocation7 + $0x188] ss:$16 sps:$4 sm:$0xff]   ;;  %v4234_v12 = vld [vmem:[#allocation7 + $0x16c] ss:$16 sps:$4 sm:$0xff]   ;;  %v4229_v13 = vld [vmem:[#allocation7 + $0x160] ss:$16 sps:$4 sm:$0xff]   ;;  %2674 = vmatprep.subr.bf16.mxu0 %v4231_v11 }
 0x255   : > { %v3804_v15 = vpop.f32.mrf.mxu0 }
 0x256   : > { %v1585_v16 = vmax.f32 %v1580_v14, 0.0  ;;  %v4232_v14 = vld [vmem:[#allocation7 + $0x168] ss:$16 sps:$4 sm:$0xff]   ;;  %v4237_v15 = vld [vmem:[#allocation7 + $0x144] ss:$16 sps:$4 sm:$0xff]  }
 0x257   : > { %2675 = vmatpush2.bf16.msra.mxu0 %v4229_v13 }
 0x258   : > { %v1586_v18 = vpack.c.bf16 %v1585_v16, %v1585_v16  ;;  %v1680_v25 = vmul.f32 %v1585_v16, %v1585_v16  ;;  %v4240_v16 = vld [vmem:[#allocation7 + $0x14c] ss:$16 sps:$4 sm:$0xff]   ;;  %2676 = vmatprep.subr.bf16.mxu0 %v4237_v15 }
 0x25a   : > { %3608 = vmatmul.mubr.msk.bf16.vlgmr.msra.gmra.mxu1 %vm1635_vm0, %v1586_v18  ;;  %v1681_v26 = vpack.c.bf16 %v1680_v25, %v1680_v25  ;;  %v4238_v18 = vld [vmem:[#allocation7 + $0x148] ss:$16 sps:$4 sm:$0xff]   ;;  %v4247_v25 = vld [vmem:[#allocation7 + $0x100] ss:$16 sps:$4 sm:$0xff]  }
 0x25b   : > { %1742 = vmatpush1.bf16.msra.mxu1 %v4145_v17  ;;  %1765 = vmatprep.mubr.bf16.mxu1 %v4532_v8  ;;  %v4228_v8 = vld [vmem:[#allocation7 + $0x18c] ss:$16 sps:$4 sm:$0xff]   ;;  %v4235_v17 = vld [vmem:[#allocation7 + $0x140] ss:$16 sps:$4 sm:$0xff]  }
 0x25c   : > { %1743 = vmatprep.subr.bf16.mxu1 %v4150_v19  ;;  %v4243_v19 = vld [vmem:[#allocation7 + $0x124] ss:$16 sps:$4 sm:$0xff]   ;;  %2677 = vmatpush2.bf16.msra.mxu0 %v4235_v17  ;;  %v4538_v17 = vmov 1326507024  }
 0x25d   : > { %2678 = vmatprep.subr.bf16.mxu0 %v4243_v19 }
 0x25f   : > { %1744 = vmatpush1.bf16.msra.mxu1 %v4148_v20  ;;  %v4246_v20 = vld [vmem:[#allocation7 + $0x12c] ss:$16 sps:$4 sm:$0xff]  }
 0x260   : > { %1745 = vmatprep.subr.bf16.mxu1 %v4153_v21  ;;  %v4241_v21 = vld [vmem:[#allocation7 + $0x120] ss:$16 sps:$4 sm:$0xff]  }
 0x261   : > { %2679 = vmatpush2.bf16.msra.mxu0 %v4241_v21 }
 0x263   : > { %1746 = vmatpush1.bf16.msra.mxu1 %v4151_v22  ;;  %v4244_v22 = vld [vmem:[#allocation7 + $0x128] ss:$16 sps:$4 sm:$0xff]  }
 0x264   : > { %1747 = vmatprep.subr.bf16.mxu1 %v4156_v23  ;;  %v4249_v23 = vld [vmem:[#allocation7 + $0x104] ss:$16 sps:$4 sm:$0xff]  }
 0x265   : > { %2680 = vmatprep.subr.bf16.mxu0 %v4249_v23 }
 0x266   : > { %2681 = vmatpush2.bf16.msra.mxu0 %v4247_v25 }
 0x267   : > { %1748 = vmatpush1.bf16.msra.mxu1 %v4154_v24  ;;  %v4252_v24 = vld [vmem:[#allocation7 + $0x10c] ss:$16 sps:$4 sm:$0xff]   ;;  %3052 = vmatprep.subr.bf16.mxu0 %v4255_v27 }
 0x268   : > { %2691 = vmatprep.subr.bf16.mxu1 %v4162_v28  ;;  %v4258_v28 = vld [vmem:[#allocation5 + $0xec] ss:$16 sps:$4 sm:$0xff]  }
 0x26a   : > { %3617 = vmatmul.mubr.msk.bf16.vlgmr.msra.gmra.mxu1 %vm1635_vm0, %v1681_v26  ;;  %v4250_v26 = vld [vmem:[#allocation7 + $0x108] ss:$16 sps:$4 sm:$0xff]  }
 0x26b   : > { %2692 = vmatpush1.bf16.msra.mxu1 %v4160_v30 }
 0x26c   : > { %2693 = vmatprep.subr.bf16.mxu1 %v4168_v32 }
 0x26f   : > { %2694 = vmatpush1.bf16.msra.mxu1 %v4166_v34 }
 0x270   : > { %2695 = vmatprep.subr.bf16.mxu1 %v4174_v36 }
 0x273   : > { %2696 = vmatpush1.bf16.msra.mxu1 %v4172_v38 }
 0x274   : > { %2697 = vmatprep.subr.bf16.mxu1 %v4180_v40 }
 0x277   : > { %2698 = vmatpush1.bf16.msra.mxu1 %v4178_v42 }
 0x278   : > { %2699 = vmatprep.subr.bf16.mxu1 %v4186_v44 }
 0x27b   : > { %2700 = vmatpush1.bf16.msra.mxu1 %v4184_v46 }
 0x27c   : > { %2701 = vmatprep.subr.bf16.mxu1 %v4192_v48 }
 0x27f   : > { %2702 = vmatpush1.bf16.msra.mxu1 %v4190_v50 }
 0x280   : > { %2703 = vmatprep.subr.bf16.mxu1 %v4198_v52 }
 0x283   : > { %2704 = vmatpush1.bf16.msra.mxu1 %v4196_v54 }
 0x284   : > { %2705 = vmatprep.subr.bf16.mxu1 %v4204_v56 }
 0x287   : > { %2706 = vmatpush1.bf16.msra.mxu1 %v4202_v58 }
 0x288   : > { %2707 = vmatprep.subr.bf16.mxu1 %v4210_v60 }
 0x28b   : > { %2708 = vmatpush2.bf16.msra.mxu1 %v4208_v62 }
 0x28c   : > { %2709 = vmatprep.subr.bf16.mxu1 %v4216_v0 }
 0x28f   : > { %2710 = vmatpush2.bf16.msra.mxu1 %v4214_v2 }
 0x290   : > { %2711 = vmatprep.subr.bf16.mxu1 %v4222_v6  ;;  %v4535_v6 = vmov 2131351028  }
 0x293   : > { %2712 = vmatpush2.bf16.msra.mxu1 %v4220_v5 }
 0x294   : > { %2713 = vmatprep.subr.bf16.mxu1 %v4228_v8  ;;  %v4536_v8 = vmov 2102212464  }
 0x297   : > { %2714 = vmatpush2.bf16.msra.mxu1 %v4226_v10  ;;  %v4537_v10 = vmov 920167782  }
 0x298   : > { %2715 = vmatprep.subr.bf16.mxu1 %v4234_v12 }
 0x29b   : > { %2716 = vmatpush2.bf16.msra.mxu1 %v4232_v14 }
 0x29c   : > { %2717 = vmatprep.subr.bf16.mxu1 %v4240_v16 }
 0x29f   : > { %2718 = vmatpush2.bf16.msra.mxu1 %v4238_v18 }
 0x2a0   : > { %2719 = vmatprep.subr.bf16.mxu1 %v4246_v20 }
 0x2a3   : > { %2720 = vmatpush2.bf16.msra.mxu1 %v4244_v22 }
 0x2a4   : > { %2721 = vmatprep.subr.bf16.mxu1 %v4252_v24 }
 0x2a7   : > { %2722 = vmatpush2.bf16.msra.mxu1 %v4250_v26 }
 0x2a8   : > { %3093 = vmatprep.subr.bf16.mxu1 %v4258_v28 }
 0x31a   : > { %v1673_v29 = vpop.f32.mrf.mxu1 }
 0x31b   : > { %v1774_v33 = vmul.f32 %v1673_v29, %v1673_v29 }
 0x31c   : > { %v1675_v30 = vpop.f32.mrf.mxu1 }
 0x31d   : > { %v1775_v35 = vmul.f32 %v1675_v30, %v1675_v30 }
 0x31e   : > { %v1677_v31 = vpop.f32.mrf.mxu1 }
 0x320   : > { %v1678_v32 = vpop.f32.mrf.mxu1 }
 0x32a   : > { %v1767_v34 = vpop.f32.mrf.mxu1 }
 0x32b   : > { %v1776_v36 = vsub.f32 %v1774_v33, %v1767_v34 }
 0x32c   : > { %v1769_v37 = vpop.f32.mrf.mxu1 }
 0x32d   : > { %v1778_v38 = vmul.f32 0.5, %v1776_v36  ;;  %v1777_v39 = vsub.f32 %v1775_v35, %v1769_v37 }
 0x32e   : > { %v1771_v40 = vpop.f32.mrf.mxu1 }
 0x32f   : > { %v1780_v41 = vadd.f32 %v1778_v38, %v1673_v29  ;;  %v1779_v42 = vmul.f32 0.5, %v1777_v39 }
 0x330   : > { %v1772_v43 = vpop.f32.mrf.mxu1 }
 0x331   : > { %v4830_v44 = vmul.f32 -0.5, %v1780_v41  ;;  %v1781_v45 = vadd.f32 %v1779_v42, %v1675_v30 }
 0x333   : > { %v1784_v46 = vand.u32 2147483647, %v4830_v44  ;;  %v1787_v47 = vand.u32 2139095040, %v4830_v44  ;;  %v4834_v48 = vmul.f32 -0.5, %v1781_v45  ;;  %vm1786_vm15 = vcmp.lt.s32.totalorder %v4830_v44, 0 }
 0x335   : > { %v1788_v49 = vshrl.u32 %v1787_v47, 23  ;;  %v1791_v50 = vand.u32 8388607, %v1784_v46  ;;  %v1890_v51 = vand.u32 2139095040, %v4834_v48  ;;  %v1887_v53 = vand.u32 2147483647, %v4834_v48 }
 0x336   : > { %vm4884_vm0 = vcmp.le.f32.partialorder %v1784_v46, 0.7853982 }
 0x337   : > { %v3618_v52 = vadd.s32 4294967169, %v1788_v49  ;;  %v1891_v54 = vshrl.u32 %v1890_v51, 23  ;;  %v1792_v56 = vor.u32 8388608, %v1791_v50  ;;  %v1894_v58 = vand.u32 8388607, %v1887_v53 }
 0x339   : > { %v1794_v55 = vadd.s32 1, %v3618_v52  ;;  %v3622_v57 = vadd.s32 4294967169, %v1891_v54  ;;  %v4842_v63 = vshll.u32 %v1792_v56, 8  ;;  %v1895_v3 = vor.u32 8388608, %v1894_v58 }
 0x33b   : > { %vm1795_vm1 = vcmp.gt.s32.totalorder %v1794_v55, 0  ;;  %v1897_v60 = vadd.s32 1, %v3622_v57  ;;  %v1935_v36 = vshll.u32 %v1895_v3, 8 }
 0x33c   : > { %v1796_v59 = vsel %vm1795_vm1, %v1794_v55, 0  ;;  %vm1889_vm1 = vcmp.lt.s32.totalorder %v4834_v48, 0 }
 0x33d   : > { %v1797_v61 = vshrl.u32 %v1796_v59, 5  ;;  %v1798_v62 = vand.u32 31, %v1796_v59  ;;  %vm1898_vm2 = vcmp.gt.s32.totalorder %v1897_v60, 0 }
 0x33e   : > { %v1899_v22 = vsel %vm1898_vm2, %v1897_v60, 0  ;;  %vm1888_vm2 = vcmp.le.f32.partialorder %v1887_v53, 0.7853982 }
 0x33f   : > { %v1799_v0 = vsub.s32 32, %v1798_v62  ;;  %v1801_v2 = vshll.u32 %v4533_v1, %v1798_v62  ;;  %v1804_v5 = vshll.u32 %v4534_v4, %v1798_v62  ;;  %v1807_v7 = vshll.u32 %v4535_v6, %v1798_v62 }
 0x340   : > { %v1810_v9 = vshll.u32 %v4536_v8, %v1798_v62  ;;  %v1813_v11 = vshll.u32 %v4537_v10, %v1798_v62  ;;  %vm1816_vm3 = vcmp.lt.s32.totalorder %v1797_v61, 1  ;;  %vm1818_vm4 = vcmp.lt.s32.totalorder %v1797_v61, 3 }
 0x341   : > { %v1802_v12 = vshrl.u32 %v4534_v4, %v1799_v0  ;;  %v1805_v13 = vshrl.u32 %v4535_v6, %v1799_v0  ;;  %v1808_v14 = vshrl.u32 %v4536_v8, %v1799_v0  ;;  %v1800_v15 = vshrl.u32 %v4533_v1, %v1799_v0 }
 0x342   : > { %v1811_v16 = vshrl.u32 %v4537_v10, %v1799_v0  ;;  %v1814_v18 = vshrl.u32 %v4538_v17, %v1799_v0  ;;  %vm1819_vm5 = vcmp.lt.s32.totalorder %v1797_v61, 4  ;;  %v1901_v25 = vand.u32 31, %v1899_v22 }
 0x343   : > { %v1803_v19 = vor.u32 %v1802_v12, %v1801_v2  ;;  %v1806_v20 = vor.u32 %v1805_v13, %v1804_v5  ;;  %v1809_v21 = vor.u32 %v1808_v14, %v1807_v7  ;;  %vm1817_vm6 = vcmp.lt.s32.totalorder %v1797_v61, 2 }
 0x344   : > { %v1812_v23 = vor.u32 %v1811_v16, %v1810_v9  ;;  %v1815_v24 = vor.u32 %v1814_v18, %v1813_v11  ;;  %v1902_v33 = vsub.s32 32, %v1901_v25  ;;  %v1900_v40 = vshrl.u32 %v1899_v22, 5 }
 0x345   : > { %v1820_v26 = vsel %vm1816_vm3, %v1800_v15, %v1803_v19  ;;  %v1821_v27 = vsel %vm1819_vm5, %v1809_v21, 2102212464  ;;  %v1824_v28 = vsel %vm1816_vm3, %v1803_v19, %v1806_v20  ;;  %v1828_v29 = vsel %vm1816_vm3, %v1806_v20, %v1809_v21 }
 0x346   : > { %v1822_v30 = vsel %vm1818_vm4, %v1806_v20, %v1821_v27  ;;  %v1825_v31 = vsel %vm1819_vm5, %v1812_v23, 920167782  ;;  %v1829_v32 = vsel %vm1819_vm5, %v1815_v24, 1326507024  ;;  %v1904_v47 = vshll.u32 %v4533_v1, %v1901_v25 }
 0x347   : > { %v1826_v34 = vsel %vm1818_vm4, %v1809_v21, %v1825_v31  ;;  %v1830_v35 = vsel %vm1818_vm4, %v1812_v23, %v1829_v32  ;;  %v1823_v37 = vsel %vm1817_vm6, %v1820_v26, %v1822_v30  ;;  %v1905_v49 = vshrl.u32 %v4534_v4, %v1902_v33 }
 0x348   : > { %v1827_v38 = vsel %vm1817_vm6, %v1824_v28, %v1826_v34  ;;  %v1831_v39 = vsel %vm1817_vm6, %v1828_v29, %v1830_v35  ;;  %v1907_v50 = vshll.u32 %v4534_v4, %v1901_v25  ;;  %v1908_v51 = vshrl.u32 %v4535_v6, %v1902_v33 }
 0x349   : > { %v4854_v41 = vmul.u32.u64.low %v4842_v63, %v1831_v39  ;;  %v4855_v42 = vmul.u32.u64.high %v4842_v63, %v1831_v39, %v4854_v41  ;;  %v4858_v43 = vmul.u32.u64.low %v4842_v63, %v1827_v38  ;;  %v4859_v45 = vmul.u32.u64.high %v4842_v63, %v1827_v38, %v4858_v43 }
 0x34a   : > { %v1910_v52 = vshll.u32 %v4535_v6, %v1901_v25  ;;  %v1911_v54 = vshrl.u32 %v4536_v8, %v1902_v33  ;;  %v1913_v55 = vshll.u32 %v4536_v8, %v1901_v25  ;;  %v1914_v56 = vshrl.u32 %v4537_v10, %v1902_v33 }
 0x34b   : > { %v1906_v57 = vor.u32 %v1905_v49, %v1904_v47  ;;  %v1909_v58 = vor.u32 %v1908_v51, %v1907_v50  ;;  %v1916_v59 = vshll.u32 %v4537_v10, %v1901_v25  ;;  %v1917_v60 = vshrl.u32 %v4538_v17, %v1902_v33 }
 0x34c   : > { %v1839_v61 = vmul.u32 %v4842_v63, %v1823_v37  ;;  %vm1841_vm7 = vc.u32 %v4855_v42, %v4858_v43  ;;  %v1842_v62 = vadd.s32 1, %v4859_v45  ;;  %v1912_v0 = vor.u32 %v1911_v54, %v1910_v52 }
 0x34d   : > { %v1903_v2 = vshrl.u32 %v4533_v1, %v1902_v33  ;;  %v1915_v3 = vor.u32 %v1914_v56, %v1913_v55  ;;  %v1918_v4 = vor.u32 %v1917_v60, %v1916_v59  ;;  %vm1919_vm8 = vcmp.lt.s32.totalorder %v1900_v40, 1 }
 0x34e   : > { %v1843_v5 = vsel %vm1841_vm7, %v1842_v62, %v4859_v45  ;;  %vm1921_vm9 = vcmp.lt.s32.totalorder %v1900_v40, 3  ;;  %vm1922_vm10 = vcmp.lt.s32.totalorder %v1900_v40, 4  ;;  %v1927_v6 = vsel %vm1919_vm8, %v1906_v57, %v1909_v58 }
 0x34f   : > { %v1844_v7 = vadd.s32 %v1843_v5, %v1839_v61  ;;  %v1924_v8 = vsel %vm1922_vm10, %v1912_v0, 2102212464  ;;  %v1928_v9 = vsel %vm1922_vm10, %v1915_v3, 920167782  ;;  %v1931_v63 = vsel %vm1919_vm8, %v1909_v58, %v1912_v0 }
 0x350   : > { %vm1920_vm11 = vcmp.lt.s32.totalorder %v1900_v40, 2  ;;  %v1923_v10 = vsel %vm1919_vm8, %v1903_v2, %v1906_v57  ;;  %v1929_v11 = vsel %vm1921_vm9, %v1912_v0, %v1928_v9  ;;  %v1932_v12 = vsel %vm1922_vm10, %v1918_v4, 1326507024  ;;  %v4274_v4 = vld [vmem:[#allocation5 + $0x88] ss:$16 sps:$4 sm:$0xff]  }
 0x351   : > { %v1845_v13 = vadd.s32 536870912, %v1844_v7  ;;  %v1925_v14 = vsel %vm1921_vm9, %v1909_v58, %v1924_v8  ;;  %v1930_v15 = vsel %vm1920_vm11, %v1927_v6, %v1929_v11  ;;  %v1933_v1 = vsel %vm1921_vm9, %v1915_v3, %v1932_v12 }
 0x352   : > { %v1934_v16 = vsel %vm1920_vm11, %v1931_v63, %v1933_v1  ;;  %v4869_v17 = vmul.u32.u64.low %v1935_v36, %v1930_v15  ;;  %v4870_v18 = vmul.u32.u64.high %v1935_v36, %v1930_v15, %v4869_v17  ;;  %v1926_v22 = vsel %vm1920_vm11, %v1923_v10, %v1925_v14 }
 0x353   : > { %v1846_v19 = vshrl.u32 %v1845_v13, 30  ;;  %v4872_v20 = vmul.u32.u64.low %v1935_v36, %v1934_v16  ;;  %v4873_v21 = vmul.u32.u64.high %v1935_v36, %v1934_v16, %v4872_v20  ;;  %v1942_v26 = vmul.u32 %v1935_v36, %v1926_v22 }
 0x354   : > { %v1945_v24 = vadd.s32 1, %v4870_v18  ;;  %v1840_v39 = vadd.s32 %v4858_v43, %v4855_v42  ;;  %vm1876_vm6 = vweird.f32 %v4830_v44 }
 0x355   : > { %v1847_v23 = vshll.u32 %v1846_v19, 30  ;;  %vm1944_vm12 = vc.u32 %v4873_v21, %v4869_v17  ;;  %v1943_v61 = vadd.s32 %v4869_v17, %v4873_v21  ;;  %v1870_v63 = vsub.s32 4, %v1846_v19 }
 0x356   : > { %v1946_v27 = vsel %vm1944_vm12, %v1945_v24, %v4870_v18 }
 0x357   : > { %v1848_v25 = vsub.s32 %v1844_v7, %v1847_v23  ;;  %v1947_v29 = vadd.s32 %v1946_v27, %v1942_v26  ;;  %v1871_v13 = vsel %vm1786_vm15, %v1870_v63, %v1846_v19  ;;  %v4288_v63 = vld [vmem:[#allocation5 + $0x4c] ss:$16 sps:$4 sm:$0xff]  }
 0x358   : > { %v1873_v1 = vsel %vm4884_vm0, 0, %v1871_v13  ;;  %v4294_v13 = vld [vmem:[#allocation5 + $0x2c] ss:$16 sps:$4 sm:$0xff]  }
 0x359   : > { %v1850_v28 = vsub.s32 0, %v1848_v25  ;;  %v1948_v31 = vadd.s32 536870912, %v1947_v29  ;;  %v1877_v18 = vand.u32 3, %v1873_v1  ;;  %v2083_v21 = vadd.s32 3, %v1873_v1  ;;  %v4300_v1 = vld [vmem:[#allocation5 + $0xc] ss:$16 sps:$4 sm:$0xff]  }
 0x35b   : > { %v3619_v30 = vmin.u32 %v1850_v28, %v1848_v25  ;;  %v1949_v33 = vshrl.u32 %v1948_v31, 30  ;;  %vm1882_vm3 = vcmp.eq.s32.totalorder %v1877_v18, 2  ;;  %vm1879_vm4 = vcmp.eq.s32.totalorder %v1877_v18, 0 }
 0x35c   : > { %v2084_v53 = vand.u32 3, %v2083_v21  ;;  %vm1878_vm5 = vcmp.lt.s32.totalorder %v1877_v18, 2  ;;  %v4303_v18 = vld [vmem:[#allocation5 + $0x1e4] ss:$16 sps:$4 sm:$0xff]   ;;  %v4301_v21 = vld [vmem:[#allocation5 + $0x1e0] ss:$16 sps:$4 sm:$0xff]  }
 0x35d   : > { %v1852_v32 = vclz %v3619_v30  ;;  %v1950_v35 = vshll.u32 %v1949_v33, 30  ;;  %v1973_v46 = vsub.s32 4, %v1949_v33 }
 0x35e   : > { %vm2086_vm7 = vcmp.eq.s32.totalorder %v2084_v53, 0  ;;  %vm2089_vm8 = vcmp.eq.s32.totalorder %v2084_v53, 2  ;;  %vm2085_vm9 = vcmp.lt.s32.totalorder %v2084_v53, 2  ;;  %v4318_v53 = vld [vmem:[#allocation5 + $0x1ac] ss:$16 sps:$4 sm:$0xff]  }
 0x35f   : > { %v3620_v34 = vadd.s32 4294967294, %v1852_v32  ;;  %v1951_v37 = vsub.s32 %v1947_v29, %v1950_v35  ;;  %v1974_v17 = vsel %vm1889_vm1, %v1973_v46, %v1949_v33  ;;  %v4292_v46 = vld [vmem:[#allocation5 + $0x28] ss:$16 sps:$4 sm:$0xff]  }
 0x360   : > { %v1976_v22 = vsel %vm1888_vm2, 0, %v1974_v17  ;;  %v4298_v17 = vld [vmem:[#allocation5 + $0x8] ss:$16 sps:$4 sm:$0xff]  }
 0x361   : > { %vm3621_vm13 = vcmp.lt.s32.totalorder %v3620_v34, 0  ;;  %v1953_v41 = vsub.s32 0, %v1951_v37  ;;  %v2187_v26 = vadd.s32 3, %v1976_v22  ;;  %v1980_v31 = vand.u32 3, %v1976_v22  ;;  %v4309_v22 = vld [vmem:[#allocation5 + $0x1c4] ss:$16 sps:$4 sm:$0xff]  }
 0x362   : > { %v1855_v38 = vsel %vm3621_vm13, 0, %v3620_v34 }
 0x363   : > { %v1856_v40 = vsub.s32 32, %v1855_v38  ;;  %v1860_v36 = vsub.s32 4294967266, %v1855_v38  ;;  %v1857_v45 = vshll.u32 %v1848_v25, %v1855_v38  ;;  %v3623_v50 = vmin.u32 %v1953_v41, %v1951_v37 }
 0x364   : > { %v2188_v30 = vand.u32 3, %v2187_v26  ;;  %vm1985_vm11 = vcmp.eq.s32.totalorder %v1980_v31, 2  ;;  %vm1982_vm13 = vcmp.eq.s32.totalorder %v1980_v31, 0  ;;  %v4315_v26 = vld [vmem:[#allocation5 + $0x1a4] ss:$16 sps:$4 sm:$0xff]  }
 0x365   : > { %v1858_v47 = vshrl.u32 %v1840_v39, %v1856_v40  ;;  %v1861_v49 = vadd.s32 127, %v1860_v36  ;;  %v1955_v54 = vclz %v3623_v50 }
 0x366   : > { %vm2193_vm10 = vcmp.eq.s32.totalorder %v2188_v30, 2  ;;  %vm2190_vm12 = vcmp.eq.s32.totalorder %v2188_v30, 0 }
 0x367   : > { %v1859_v51 = vor.u32 %v1858_v47, %v1857_v45  ;;  %v1862_v52 = vshll.u32 %v1861_v49, 23  ;;  %v3624_v56 = vadd.s32 4294967294, %v1955_v54  ;;  %v4253_v54 = vld [vmem:[#allocation5 + $0xe0] ss:$16 sps:$4 sm:$0xff]  }
 0x369   : > { %v1863_v55 = vor.u32 4788187, %v1862_v52  ;;  %v1866_v58 = vcvt.s32.f32 %v1859_v51  ;;  %vm3625_vm14 = vcmp.lt.s32.totalorder %v3624_v56, 0 }
 0x36a   : > { %v1958_v59 = vsel %vm3625_vm14, 0, %v3624_v56  ;;  %vm2189_vm14 = vcmp.lt.s32.totalorder %v2188_v30, 2  ;;  %v4321_v30 = vld [vmem:[#allocation5 + $0x184] ss:$16 sps:$4 sm:$0xff]  }
 0x36b   : > { %v1864_v57 = vand.u32 2147483647, %v1863_v55  ;;  %v1959_v42 = vsub.s32 32, %v1958_v59  ;;  %v1963_v43 = vsub.s32 4294967266, %v1958_v59  ;;  %v1960_v0 = vshll.u32 %v1951_v37, %v1958_v59  ;;  %v4256_v55 = vld [vmem:[#allocation5 + $0xe8] ss:$16 sps:$4 sm:$0xff]  }
 0x36c   : > { %v4264_v59 = vld [vmem:[#allocation5 + $0xcc] ss:$16 sps:$4 sm:$0xff]  }
 0x36d   : > { %v1867_v60 = vmul.f32 %v1866_v58, %v1864_v57  ;;  %v1961_v2 = vshrl.u32 %v1943_v61, %v1959_v42  ;;  %v1964_v3 = vadd.s32 127, %v1963_v43  ;;  %v4261_v58 = vld [vmem:[#allocation5 + $0xc4] ss:$16 sps:$4 sm:$0xff]   ;;  %v4262_v61 = vld [vmem:[#allocation5 + $0xc8] ss:$16 sps:$4 sm:$0xff]  }
 0x36e   : > { %v4270_v42 = vld [vmem:[#allocation5 + $0xac] ss:$16 sps:$4 sm:$0xff]   ;;  %v4265_v43 = vld [vmem:[#allocation5 + $0xa0] ss:$16 sps:$4 sm:$0xff]  }
 0x36f   : > { %v1868_v62 = vxor.u32 2147483648, %v1867_v60  ;;  %v1962_v6 = vor.u32 %v1961_v2, %v1960_v0  ;;  %v1965_v7 = vshll.u32 %v1964_v3, 23  ;;  %v4273_v0 = vld [vmem:[#allocation5 + $0x84] ss:$16 sps:$4 sm:$0xff]   ;;  %v4276_v2 = vld [vmem:[#allocation5 + $0x8c] ss:$16 sps:$4 sm:$0xff]  }
 0x370   : > { %v4271_v3 = vld [vmem:[#allocation5 + $0x80] ss:$16 sps:$4 sm:$0xff]  }
 0x371   : > { %v1869_v5 = vsel %vm1786_vm15, %v1868_v62, %v1867_v60  ;;  %v1966_v9 = vor.u32 4788187, %v1965_v7  ;;  %v1969_v11 = vcvt.s32.f32 %v1962_v6  ;;  %vm1981_vm15 = vcmp.lt.s32.totalorder %v1980_v31, 2  ;;  %v4268_v62 = vld [vmem:[#allocation5 + $0xa8] ss:$16 sps:$4 sm:$0xff]  }
 0x372   : > { %v1872_v8 = vsel %vm4884_vm0, %v4830_v44, %v1869_v5  ;;  %vm1979_vm0 = vweird.f32 %v4834_v48  ;;  %v4267_v44 = vld [vmem:[#allocation5 + $0xa4] ss:$16 sps:$4 sm:$0xff]   ;;  %v4282_v6 = vld [vmem:[#allocation5 + $0x6c] ss:$16 sps:$4 sm:$0xff]   ;;  %v4277_v7 = vld [vmem:[#allocation5 + $0x60] ss:$16 sps:$4 sm:$0xff]  }
 0x373   : > { %4365 = vcosq.f32 %v1872_v8  ;;  %v1967_v10 = vand.u32 2147483647, %v1966_v9  ;;  %v4279_v5 = vld [vmem:[#allocation5 + $0x64] ss:$16 sps:$4 sm:$0xff]   ;;  %v4324_v31 = vld [vmem:[#allocation5 + $0x18c] ss:$16 sps:$4 sm:$0xff]  }
 0x374   : > { %4367 = vsinq.f32 %v1872_v8  ;;  %v4280_v8 = vld [vmem:[#allocation5 + $0x68] ss:$16 sps:$4 sm:$0xff]   ;;  %v4285_v9 = vld [vmem:[#allocation5 + $0x44] ss:$16 sps:$4 sm:$0xff]  }
 0x375   : > { %v1970_v12 = vmul.f32 %v1969_v11, %v1967_v10  ;;  %v4283_v10 = vld [vmem:[#allocation5 + $0x40] ss:$16 sps:$4 sm:$0xff]   ;;  %v4286_v11 = vld [vmem:[#allocation5 + $0x48] ss:$16 sps:$4 sm:$0xff]  }
 0x377   : > { %v1971_v14 = vxor.u32 2147483648, %v1970_v12 }
 0x379   : > { %v1972_v15 = vsel %vm1889_vm1, %v1971_v14, %v1970_v12  ;;  %v4291_v12 = vld [vmem:[#allocation5 + $0x24] ss:$16 sps:$4 sm:$0xff]   ;;  %v4289_v14 = vld [vmem:[#allocation5 + $0x20] ss:$16 sps:$4 sm:$0xff]   ;;  %vm3317_vm1 = vcmask 80896  }
 0x37a   : > { %v1975_v16 = vsel %vm1888_vm2, %v4834_v48, %v1972_v15  ;;  %v4259_v48 = vld [vmem:[#allocation5 + $0xc0] ss:$16 sps:$4 sm:$0xff]   ;;  %v4297_v15 = vld [vmem:[#allocation5 + $0x4] ss:$16 sps:$4 sm:$0xff]  }
 0x37b   : > { %4369 = vcosq.f32 %v1975_v16 }
 0x37c   : > { %4371 = vsinq.f32 %v1975_v16  ;;  %v4295_v16 = vld [vmem:[#allocation5] ss:$16 sps:$4 sm:$0xff]  }
 0x380   : > { %v4366_v20 = vpop.eup %4365 }
 0x381   : > { %v4368_v19 = vpop.eup %4367  ;;  %v1883_v23 = vxor.u32 2147483648, %v4366_v20 }
 0x382   : > { %v1880_v24 = vxor.u32 2147483648, %v4368_v19 }
 0x383   : > { %v1884_v25 = vsel %vm1882_vm3, %v1883_v23, %v4368_v19  ;;  %v2091_v33 = vsel %vm2089_vm8, %v1883_v23, %v4368_v19  ;;  %v4304_v19 = vld [vmem:[#allocation5 + $0x1e8] ss:$16 sps:$4 sm:$0xff]   ;;  %v4312_v23 = vld [vmem:[#allocation5 + $0x1cc] ss:$16 sps:$4 sm:$0xff]  }
 0x384   : > { %v1881_v27 = vsel %vm1879_vm4, %v4366_v20, %v1880_v24  ;;  %v2088_v32 = vsel %vm2086_vm7, %v4366_v20, %v1880_v24  ;;  %v4306_v20 = vld [vmem:[#allocation5 + $0x1ec] ss:$16 sps:$4 sm:$0xff]   ;;  %v4307_v24 = vld [vmem:[#allocation5 + $0x1c0] ss:$16 sps:$4 sm:$0xff]  }
 0x385   : > { %v1885_v28 = vsel %vm1878_vm5, %v1881_v27, %v1884_v25  ;;  %v2092_v39 = vsel %vm2085_vm9, %v2088_v32, %v2091_v33  ;;  %v4310_v25 = vld [vmem:[#allocation5 + $0x1c8] ss:$16 sps:$4 sm:$0xff]   ;;  %v4313_v27 = vld [vmem:[#allocation5 + $0x1a0] ss:$16 sps:$4 sm:$0xff]  }
 0x386   : > { %v4900_v29 = vsel %vm1876_vm6, nan, %v1885_v28  ;;  %v2093_v49 = vsel %vm1876_vm6, nan, %v2092_v39  ;;  %v4316_v28 = vld [vmem:[#allocation5 + $0x1a8] ss:$16 sps:$4 sm:$0xff]   ;;  %v4319_v32 = vld [vmem:[#allocation5 + $0x180] ss:$16 sps:$4 sm:$0xff]  }
 0x387   : > { %v2264_v57 = vpack.c.bf16 %v2093_v49, %v2093_v49  ;;  %v4322_v33 = vld [vmem:[#allocation5 + $0x188] ss:$16 sps:$4 sm:$0xff]   ;;  %v4333_v39 = vld [vmem:[#allocation5 + $0x144] ss:$16 sps:$4 sm:$0xff]   ;;  %v4337_v49 = vld [vmem:[#allocation5 + $0x120] ss:$16 sps:$4 sm:$0xff]  }
 0x388   : > { %v4370_v34 = vpop.eup %4369 }
 0x389   : > { %v4372_v35 = vpop.eup %4371  ;;  %v1986_v37 = vxor.u32 2147483648, %v4370_v34 }
 0x38a   : > { %v1983_v38 = vxor.u32 2147483648, %v4372_v35 }
 0x38b   : > { %v2195_v40 = vsel %vm2193_vm10, %v1986_v37, %v4372_v35  ;;  %v1987_v36 = vsel %vm1985_vm11, %v1986_v37, %v4372_v35  ;;  %v4330_v35 = vld [vmem:[#allocation5 + $0x16c] ss:$16 sps:$4 sm:$0xff]   ;;  %v4325_v37 = vld [vmem:[#allocation5 + $0x160] ss:$16 sps:$4 sm:$0xff]  }
 0x38c   : > { %v2192_v41 = vsel %vm2190_vm12, %v4370_v34, %v1983_v38  ;;  %v1984_v45 = vsel %vm1982_vm13, %v4370_v34, %v1983_v38  ;;  %v4327_v34 = vld [vmem:[#allocation5 + $0x164] ss:$16 sps:$4 sm:$0xff]   ;;  %v4328_v38 = vld [vmem:[#allocation5 + $0x168] ss:$16 sps:$4 sm:$0xff]  }
 0x38d   : > { %v2196_v47 = vsel %vm2189_vm14, %v2192_v41, %v2195_v40  ;;  %v1988_v50 = vsel %vm1981_vm15, %v1984_v45, %v1987_v36  ;;  %v4336_v40 = vld [vmem:[#allocation5 + $0x14c] ss:$16 sps:$4 sm:$0xff]   ;;  %v4331_v36 = vld [vmem:[#allocation5 + $0x140] ss:$16 sps:$4 sm:$0xff]   ;;  %v4334_v41 = vld [vmem:[#allocation5 + $0x148] ss:$16 sps:$4 sm:$0xff]  }
 0x38e   : > { %v2197_v51 = vsel %vm1979_vm0, nan, %v2196_v47  ;;  %v1989_v56 = vsel %vm1979_vm0, nan, %v1988_v50  ;;  %v4339_v45 = vld [vmem:[#allocation5 + $0x124] ss:$16 sps:$4 sm:$0xff]   ;;  %v4342_v47 = vld [vmem:[#allocation5 + $0x12c] ss:$16 sps:$4 sm:$0xff]  }
 0x38f   : > { %v2265_v52 = vpack.c.bf16 %v2197_v51, %v2197_v51  ;;  %v2199_v60 = vpack.c.bf16 %v1989_v56, %v1989_v56  ;;  %v4340_v50 = vld [vmem:[#allocation5 + $0x128] ss:$16 sps:$4 sm:$0xff]   ;;  %v4345_v51 = vld [vmem:[#allocation5 + $0x104] ss:$16 sps:$4 sm:$0xff]   ;;  %v2198_v56 = vpack.c.bf16 %v4900_v29, %v4900_v29 }
 0x390   : > { %v4352_v29 = vld [vmem:[%s5004_s9 + $0x30] sm:$0xff]  }
 0x391   : > { %2682 = vmatprep.mubr.bf16.mxu0 %v2265_v52  ;;  %2723 = vmatprep.mubr.bf16.mxu1 %v2265_v52  ;;  %v4348_v52 = vld [vmem:[#allocation5 + $0x10c] ss:$16 sps:$4 sm:$0xff]  }
 0x392   : > { %2683 = vmatmul.mubr.bf16.vlgmr.msra.gmra.mxu0 %v2264_v57  ;;  %2724 = vmatmul.mubr.bf16.vlgmr.msra.gmra.mxu1 %v2264_v57  ;;  %v4349_v57 = vld [vmem:[%s5004_s9 + $0x78] sm:$0xff]  }
 0x393   : > { %3053 = vmatpush1.bf16.msra.mxu0 %v4253_v54  ;;  %3094 = vmatpush1.bf16.msra.mxu1 %v4256_v55  ;;  %v4343_v54 = vld [vmem:[#allocation5 + $0x100] ss:$16 sps:$4 sm:$0xff]   ;;  %v4346_v55 = vld [vmem:[#allocation5 + $0x108] ss:$16 sps:$4 sm:$0xff]  }
 0x394   : > { %3084 = vmatprep.mubr.bf16.mxu0 %v2199_v60  ;;  %3125 = vmatprep.mubr.bf16.mxu1 %v2199_v60  ;;  %v4353_v60 = vld [vmem:[%s5004_s9 + $0x68] sm:$0xff]  }
 0x395   : > { %3054 = vmatprep.subr.bf16.mxu0 %v4261_v58  ;;  %3095 = vmatprep.subr.bf16.mxu1 %v4264_v59  ;;  %v4350_v58 = vld [vmem:[%s5004_s9 + $0x38] sm:$0xff]   ;;  %v4351_v59 = vld [vmem:[%s5004_s9 + $0x70] sm:$0xff]  }
 0x397   : > { %3055 = vmatpush1.bf16.msra.mxu0 %v4259_v48  ;;  %3096 = vmatpush1.bf16.msra.mxu1 %v4262_v61  ;;  %v4354_v48 = vld [vmem:[%s5004_s9 + $0x28] sm:$0xff]   ;;  %v4355_v61 = vld [vmem:[%s5004_s9 + $0x60] sm:$0xff]  }
 0x398   : > { %3056 = vmatprep.subr.bf16.mxu0 %v4267_v44  ;;  %3097 = vmatprep.subr.bf16.mxu1 %v4270_v42  ;;  %v4356_v44 = vld [vmem:[%s5004_s9 + $0x20] sm:$0xff]   ;;  %v4357_v42 = vld [vmem:[%s5004_s9 + $0x58] sm:$0xff]  }
 0x39b   : > { %3057 = vmatpush1.bf16.msra.mxu0 %v4265_v43  ;;  %3098 = vmatpush1.bf16.msra.mxu1 %v4268_v62  ;;  %v4358_v43 = vld [vmem:[%s5004_s9 + $0x18] sm:$0xff]   ;;  %v4359_v62 = vld [vmem:[%s5004_s9 + $0x50] sm:$0xff]  }
 0x39c   : > { %3058 = vmatprep.subr.bf16.mxu0 %v4273_v0  ;;  %3099 = vmatprep.subr.bf16.mxu1 %v4276_v2  ;;  %v4360_v0 = vld [vmem:[%s5004_s9 + $0x10] sm:$0xff]   ;;  %v4361_v2 = vld [vmem:[%s5004_s9 + $0x48] sm:$0xff]  }
 0x39f   : > { %3059 = vmatpush1.bf16.msra.mxu0 %v4271_v3  ;;  %3100 = vmatpush1.bf16.msra.mxu1 %v4274_v4  ;;  %v4362_v3 = vld [vmem:[%s5004_s9 + $0x8] sm:$0xff]   ;;  %v4363_v4 = vld [vmem:[%s5004_s9 + $0x40] sm:$0xff]  }
 0x3a0   : > { %3060 = vmatprep.subr.bf16.mxu0 %v4279_v5  ;;  %3101 = vmatprep.subr.bf16.mxu1 %v4282_v6  ;;  %v4364_v5 = vld [vmem:[%s5004_s9] sm:$0xff]  }
 0x3a3   : > { %3061 = vmatpush1.bf16.msra.mxu0 %v4277_v7  ;;  %3102 = vmatpush1.bf16.msra.mxu1 %v4280_v8 }
 0x3a4   : > { %3062 = vmatprep.subr.bf16.mxu0 %v4285_v9  ;;  %3103 = vmatprep.subr.bf16.mxu1 %v4288_v63 }
 0x3a7   : > { %3063 = vmatpush1.bf16.msra.mxu0 %v4283_v10  ;;  %3104 = vmatpush1.bf16.msra.mxu1 %v4286_v11 }
 0x3a8   : > { %3064 = vmatprep.subr.bf16.mxu0 %v4291_v12  ;;  %3105 = vmatprep.subr.bf16.mxu1 %v4294_v13 }
 0x3ab   : > { %3065 = vmatpush1.bf16.msra.mxu0 %v4289_v14  ;;  %3106 = vmatpush1.bf16.msra.mxu1 %v4292_v46 }
 0x3ac   : > { %3066 = vmatprep.subr.bf16.mxu0 %v4297_v15  ;;  %3107 = vmatprep.subr.bf16.mxu1 %v4300_v1 }
 0x3af   : > { %3067 = vmatpush1.bf16.msra.mxu0 %v4295_v16  ;;  %3108 = vmatpush1.bf16.msra.mxu1 %v4298_v17 }
 0x3b0   : > { %3068 = vmatprep.subr.bf16.mxu0 %v4303_v18  ;;  %3109 = vmatprep.subr.bf16.mxu1 %v4306_v20 }
 0x3b3   : > { %3069 = vmatpush2.bf16.msra.mxu0 %v4301_v21  ;;  %3110 = vmatpush2.bf16.msra.mxu1 %v4304_v19 }
 0x3b4   : > { %3070 = vmatprep.subr.bf16.mxu0 %v4309_v22  ;;  %3111 = vmatprep.subr.bf16.mxu1 %v4312_v23 }
 0x3b7   : > { %3071 = vmatpush2.bf16.msra.mxu0 %v4307_v24  ;;  %3112 = vmatpush2.bf16.msra.mxu1 %v4310_v25 }
 0x3b8   : > { %3072 = vmatprep.subr.bf16.mxu0 %v4315_v26  ;;  %3113 = vmatprep.subr.bf16.mxu1 %v4318_v53 }
 0x3bb   : > { %3073 = vmatpush2.bf16.msra.mxu0 %v4313_v27  ;;  %3114 = vmatpush2.bf16.msra.mxu1 %v4316_v28 }
 0x3bc   : > { %3074 = vmatprep.subr.bf16.mxu0 %v4321_v30  ;;  %3115 = vmatprep.subr.bf16.mxu1 %v4324_v31 }
 0x3bf   : > { %3075 = vmatpush2.bf16.msra.mxu0 %v4319_v32  ;;  %3116 = vmatpush2.bf16.msra.mxu1 %v4322_v33  ;;  %v3762_v33 = vld [vmem:[%s5005_s10] ss:$0 sm:$0xff] }
 0x3c0   : > { %3076 = vmatprep.subr.bf16.mxu0 %v4327_v34  ;;  %3117 = vmatprep.subr.bf16.mxu1 %v4330_v35 }
 0x3c3   : > { %3077 = vmatpush2.bf16.msra.mxu0 %v4325_v37  ;;  %3118 = vmatpush2.bf16.msra.mxu1 %v4328_v38 }
 0x3c4   : > { %3078 = vmatprep.subr.bf16.mxu0 %v4333_v39  ;;  %3119 = vmatprep.subr.bf16.mxu1 %v4336_v40 }
 0x3c7   : > { %3079 = vmatpush2.bf16.msra.mxu0 %v4331_v36  ;;  %3120 = vmatpush2.bf16.msra.mxu1 %v4334_v41 }
 0x3c8   : > { %3080 = vmatprep.subr.bf16.mxu0 %v4339_v45  ;;  %3121 = vmatprep.subr.bf16.mxu1 %v4342_v47 }
 0x3cb   : > { %3081 = vmatpush2.bf16.msra.mxu0 %v4337_v49  ;;  %3122 = vmatpush2.bf16.msra.mxu1 %v4340_v50 }
 0x3cc   : > { %3082 = vmatprep.subr.bf16.mxu0 %v4345_v51  ;;  %3123 = vmatprep.subr.bf16.mxu1 %v4348_v52 }
 0x3cf   : > { %3083 = vmatpush2.bf16.msra.mxu0 %v4343_v54  ;;  %3124 = vmatpush2.bf16.msra.mxu1 %v4346_v55 }
 0x3d0   : > { %3806 = vmatprep.subr.bf16.mxu0 %v4349_v57 }
 0x3d2   : > { %3085 = vmatmul.mubr.bf16.vlgmr.msra.gmra.mxu0 %v2198_v56  ;;  %3126 = vmatmul.mubr.bf16.vlgmr.msra.gmra.mxu1 %v2198_v56 }
 0x3d3   : > { %3807 = vmatpush3.bf16.msra.mxu0 %v4350_v58 }
 0x3d4   : > { %3808 = vmatprep.subr.bf16.mxu0 %v4351_v59 }
 0x3d7   : > { %3809 = vmatpush3.bf16.msra.mxu0 %v4352_v29 }
 0x3d8   : > { %3810 = vmatprep.subr.bf16.mxu0 %v4353_v60 }
 0x3db   : > { %3811 = vmatpush3.bf16.msra.mxu0 %v4354_v48 }
 0x3dc   : > { %3812 = vmatprep.subr.bf16.mxu0 %v4355_v61 }
 0x3df   : > { %3813 = vmatpush3.bf16.msra.mxu0 %v4356_v44 }
 0x3e0   : > { %3814 = vmatprep.subr.bf16.mxu0 %v4357_v42 }
 0x3e3   : > { %3815 = vmatpush3.bf16.msra.mxu0 %v4358_v43 }
 0x3e4   : > { %3816 = vmatprep.subr.bf16.mxu0 %v4359_v62 }
 0x3e7   : > { %3817 = vmatpush3.bf16.msra.mxu0 %v4360_v0 }
 0x3e8   : > { %3818 = vmatprep.subr.bf16.mxu0 %v4361_v2 }
 0x3eb   : > { %3819 = vmatpush3.bf16.msra.mxu0 %v4362_v3 }
 0x3ec   : > { %3820 = vmatprep.subr.bf16.mxu0 %v4363_v4 }
 0x3ef   : > { %3821 = vmatpush3.bf16.msra.mxu0 %v4364_v5 }
 0x452   : > { %v2684_v6 = vpop.f32.mrf.mxu0  ;;  %v2725_v7 = vpop.f32.mrf.mxu1 }
 0x454   : > { %v2686_v8 = vpop.f32.mrf.mxu0  ;;  %v2727_v9 = vpop.f32.mrf.mxu1 }
 0x456   : > { %v2688_v63 = vpop.f32.mrf.mxu0  ;;  %v2729_v10 = vpop.f32.mrf.mxu1 }
 0x458   : > { %v2689_v11 = vpop.f32.mrf.mxu0  ;;  %v2730_v12 = vpop.f32.mrf.mxu1 }
 0x492   : > { %v3086_v13 = vpop.f32.mrf.mxu0  ;;  %v3127_v14 = vpop.f32.mrf.mxu1 }
 0x493   : > { %v3087_v46 = vadd.f32 %v3086_v13, %v2684_v6  ;;  %v3128_v15 = vadd.f32 %v3127_v14, %v2725_v7 }
 0x494   : > { %v3088_v1 = vpop.f32.mrf.mxu0  ;;  %v3129_v16 = vpop.f32.mrf.mxu1 }
 0x495   : > { %v3134_v17 = vmul.f32 %v3087_v46, %v3087_v46  ;;  %v3136_v18 = vmul.f32 %v3128_v15, %v3128_v15  ;;  %v3089_v20 = vadd.f32 %v3088_v1, %v2686_v8  ;;  %v3130_v21 = vadd.f32 %v3129_v16, %v2727_v9 }
 0x496   : > { %v3090_v19 = vpop.f32.mrf.mxu0  ;;  %v3131_v22 = vpop.f32.mrf.mxu1 }
 0x497   : > { %v3138_v23 = vadd.f32 %v3136_v18, %v3134_v17  ;;  %v3135_v24 = vmul.f32 %v3089_v20, %v3089_v20  ;;  %v3137_v25 = vmul.f32 %v3130_v21, %v3130_v21 }
 0x498   : > { %v3091_v26 = vpop.f32.mrf.mxu0  ;;  %v3132_v53 = vpop.f32.mrf.mxu1 }
 0x499   : > { %v3139_v27 = vadd.f32 %v3137_v25, %v3135_v24  ;;  %v3140_v30 = vpack.c.bf16 %v3138_v23, %v3138_v23 }
 0x49b   : > { %v3141_v28 = vpack.c.bf16 %v3139_v27, %v3139_v27 }
 0x49d   : > { %3309 = vmatprep.mubr.bf16.mxu0 %v3141_v28 }
 0x49e   : > { %3310 = vmatmul.mubr.bf16.vlgmr.msra.gmra.mxu0 %v3140_v30 }
 0x55e   : > { %v3822_v31 = vpop.f32.mrf.mxu0 }
 0x560   : > { %v3823_v32 = vpop.f32.mrf.mxu0 }
 0x561   : > { %v3824_v34 = vadd.f32 %v3823_v32, %v3822_v31 }
 0x562   : > { %v3825_v35 = vpop.f32.mrf.mxu0 }
 0x563   : > { %v3312_v37 = vadd.f32 %v3824_v34, %v3762_v33 }
 0x564   : > { %v3826_v38 = vpop.f32.mrf.mxu0 }
 0x565   : > { %v3318_v39 = vsel %vm3317_vm1, %v3312_v37, -inf }
 0x566   : > { %3319 = vmax.xlane.f32.xlu0 %v3318_v39 }
 0x5ef   : > { %v3320_v40 = vpop.xlane.xlu0 %3319 }
 0x5f0   : > { %v3321_v36 = vsub.f32 %v3312_v37, %v3320_v40 }
 0x5f2   : > { %v3322_v41 = vmul.f32 1.442695, %v3321_v36 }
 0x5f4   : > { %4373 = vpow2.f32 %v3322_v41 }
 0x601   : > { %v4374_v45 = vpop.eup %4373 }
 0x602   : > { %v3324_v47 = vsel %vm3317_vm1, %v4374_v45, 0.0 }
 0x603   : > { %3325 = vadd.xlane.f32.xlu0 %v3324_v47 }
 0x68c   : > { %v3326_v49 = vpop.xlane.xlu0 %3325 }
 0x68d   : > { %4375 = vrcp.f32 %v3326_v49 }
 0x69a   : > { %v4376_v50 = vpop.eup %4375 }
 0x69b   : > { %v3328_v51 = vmul.f32 %v4376_v50, %v4374_v45 }
 0x69d   : > { %3329 = vst.msk [vmem:[%s423_s14] sm:$0xff] %vm3317_vm1, %v3328_v51 }
 0x69e   : > { %4468 = shalt.err (!%p4465_p0)
}
 0x69f   : > { %s4469_s13 = scalar_lea.hbm %s3342_s30, 128  ;;  %s4473_s24 = scalar_lea.hbm %s5006_s11, 256 }
 0x6a0   : > { %p4470_p1 = scmp.ne.s32.totalorder %s3342_s30, %s4469_s13  ;;  %p4474_p4 = scmp.lt.s32.totalorder %s3342_s30, %s5006_s11 }
 0x6a1   : > { %p4475_p9 = scmp.lt.s32.totalorder %s4473_s24, %s4469_s13 }
 0x6a2   : > { %p4471_p2 = pnand %p4470_p1, %p4638_p5 }
 0x6a3   : > { %p4476_p10 = por %p4475_p9, %p4474_p4 }
 0x6a4   : > { %p4472_p3 = pneg %p4471_p2 }
 0x6a6   : > { %p4477_p12 = pnand %p4476_p10, %p4472_p3 }
 0x6a8   : > { %4480 = shalt.err (!%p4477_p12)
}
 0x6a9   : > { %3848 = dma.vmem_to_hbm [thread:$0]  (%p4638_p5), %s3345_s16, 128, %s3342_s30, %s3331_s19  }
 0x6aa PF: > { %p3870_p13 = scmp.ge.s32.totalorder %s4523_s20, 2  ;;  %s3356_s25 = sand.u32 1, %s4511_s17  }
 0x6ab   : > { %s3357_s23 = scalar_lea.sflag [#allocation4], %s3356_s25 }
 0x6ac   : > { %p3861_p7 = pnand %p3870_p13, %p4642_p6 }
 0x6ae   : > { %p3862_p8 = pneg %p3861_p7 }
 0x6b0   : > { %4506 = dma.done.wait (%p3862_p8), %s3357_s23, 128  }
 0x6b1   : > { %4508 = vsyncadd (%p3862_p8), %s3357_s23, 4294967168  ;;  %s5019_s20 = sld [smem:[#allocation13_spill]]  ;;  %s5022_s17 = smov %s4515_s18 }
 0x6b2   : > { %s5020_s26 = sld [smem:[#allocation12_spill]] }
 0x6b3   : > { %s5021_s19 = sld [smem:[#allocation14_spill]] }
 0x6b7   : > { %p23_p11 = scmp.ge.s32.totalorder %s5019_s20, 4  }
 0x6b8   : > { %s5023_s18 = smov %s5020_s26 }
 0x6b9   :  { %25 = sbr.rel (!%p23_p11) target bundleno = 5 (0x5), region = 112 }
 0x6be   :  { %3362 = vsyncpa [#allocation3], 1 }
 0x6bf   :  { %3364 = vsyncpa [#allocation3 + $0x1], 1 }
 0x6c0   :  { %3365 = vsyncpa [#allocation6], 1 }
 0x6c1   :  { %3366 = vsyncpa [#allocation4], 1 }
 0x6c2   :  { %3368 = vsyncpa [#allocation4 + $0x1], 1 }

</bundles_post_ra>
